<compile_context>
chip_gen: v7x
topology: tpu7x:2x2x1
jax: 0.10.0
libtpu: 0.0.40
codegen_flags: <defaults>
</compile_context>

<pallas_src>
import math

import jax
import jax.numpy as jnp
from jax.experimental import pallas as pl
from jax.experimental.pallas import tpu as pltpu

# ---------------- config (small, shape-consistent stand-in for DistilBERT) ---
VOCAB = 64
MAX_POS = 16
HIDDEN = 32          # stand-in for 768
N_HEADS = 2
HEAD_DIM = HIDDEN // N_HEADS
N_LAYERS = 2         # stand-in for 6
FFN_DIM = 2 * HIDDEN
BATCH = 2
SEQ = 8
OUT_PAD = 128        # lane-dense padded QA-head width (real logits in cols 0,1)
LN_EPS = 1e-12
ATTN_SCALE = 1.0 / math.sqrt(HEAD_DIM)


# --------------------------- in-kernel math helpers ---------------------------
def _layernorm(x, g, b):
    """x: [R, H] f32; g, b: [1, H]."""
    mu = jnp.mean(x, axis=-1, keepdims=True)
    var = jnp.mean(jnp.square(x - mu), axis=-1, keepdims=True)
    y = (x - mu) * jax.lax.rsqrt(var + LN_EPS)
    return y * g.astype(jnp.float32) + b.astype(jnp.float32)


def _gelu_tanh(x):
    # tanh-approx GELU: jnp.tanh lowers to the EUP slot, keeping the VALU
    # dependent chain short.  (~1e-3 abs diff vs HF's exact-erf GELU.)
    c = 0.7978845608028654  # sqrt(2/pi)
    return 0.5 * x * (1.0 + jnp.tanh(c * (x + 0.044715 * x * x * x)))


# ------------------------------- fused kernel ---------------------------------
def _fused_forward_kernel(ids_ref, mask_ref,
                          word_emb_ref, pos_emb_ref,
                          emb_g_ref, emb_b_ref,
                          wqkv_ref, bqkv_ref, wo_ref, bo_ref,
                          ln1_g_ref, ln1_b_ref, w1_ref, b1_ref,
                          w2_ref, b2_ref, ln2_g_ref, ln2_b_ref,
                          qa_w_ref, qa_b_ref,
                          out_ref):
    """Whole forward pass (embedding -> transformer stack -> QA head), one step."""
    BS = BATCH * SEQ

    # ---- in-kernel embedding lookup: one-hot MXU matmul (table is 8 KB) ----
    ids = ids_ref[...]                                            # [BS, 1] int32
    vocab_iota = jax.lax.broadcasted_iota(jnp.int32, (BS, VOCAB), 1)
    onehot = (vocab_iota == ids).astype(jnp.float32)              # [BS, VOCAB]
    x = jnp.dot(onehot, word_emb_ref[...].astype(jnp.float32),
                preferred_element_type=jnp.float32)               # [BS, H]
    pos = pos_emb_ref[...].astype(jnp.float32)                    # [S, H]
    x = x + jnp.concatenate([pos] * BATCH, axis=0)                # positions repeat per batch row
    x = _layernorm(x, emb_g_ref[...], emb_b_ref[...])

    # ---- additive attention bias, hoisted & fully broadcast once ----
    neg = (1.0 - mask_ref[...].astype(jnp.float32)) * -1e9        # [B, S]
    bias_sq = jnp.stack(
        [jnp.broadcast_to(neg[b:b + 1, :], (SEQ, SEQ))
         for b in range(BATCH) for _ in range(N_HEADS)], axis=0)  # [B*NH, S, S]

    for l in range(N_LAYERS):                                     # static unroll
        # ---- fused QKV projection: one MXU pass, result stays in vregs ----
        qkv = jnp.dot(x, wqkv_ref[l], preferred_element_type=jnp.float32)
        qkv = qkv + bqkv_ref[l].astype(jnp.float32)               # [BS, 3H]

        # ---- batched (batch*head) attention: single einsum per score/ctx ----
        def _heads(base):
            return jnp.stack(
                [qkv[b * SEQ:(b + 1) * SEQ,
                     base + h * HEAD_DIM: base + (h + 1) * HEAD_DIM]
                 for b in range(BATCH) for h in range(N_HEADS)],
                axis=0)                                           # [B*NH, S, Dh]

        q_n = _heads(0)
        k_n = _heads(HIDDEN)
        v_n = _heads(2 * HIDDEN)

        s = jnp.einsum('nqd,nkd->nqk', q_n, k_n,
                       preferred_element_type=jnp.float32)        # [B*NH, S, S]
        s = s * ATTN_SCALE + bias_sq
        m = jnp.max(s, axis=-1, keepdims=True)
        p = jnp.exp(s - m)
        p = p * pl.reciprocal(jnp.sum(p, axis=-1, keepdims=True), approx=True)
        ctx_n = jnp.einsum('nqk,nkd->nqd', p, v_n,
                           preferred_element_type=jnp.float32)    # [B*NH, S, Dh]

        # Merge heads back to [BS, H] without any VMEM scratch.
        ctx = jnp.concatenate(
            [jnp.concatenate([ctx_n[b * N_HEADS + h] for h in range(N_HEADS)],
                             axis=-1)
             for b in range(BATCH)], axis=0)                      # [BS, H]

        # ---- output projection + residual + post-LN (DistilBERT style) ----
        attn = jnp.dot(ctx, wo_ref[l], preferred_element_type=jnp.float32)
        attn = attn + bo_ref[l].astype(jnp.float32)
        x = _layernorm(x + attn, ln1_g_ref[l], ln1_b_ref[l])

        # ---- FFN (tanh GELU) + residual + post-LN ----
        ffn = jnp.dot(x, w1_ref[l], preferred_element_type=jnp.float32)
        ffn = _gelu_tanh(ffn + b1_ref[l].astype(jnp.float32))
        ffn = jnp.dot(ffn, w2_ref[l], preferred_element_type=jnp.float32)
        ffn = ffn + b2_ref[l].astype(jnp.float32)
        x = _layernorm(x + ffn, ln2_g_ref[l], ln2_b_ref[l])

    # ---- QA head folded in; padded to 128 lanes => unmasked, lane-dense store ----
    logits = jnp.dot(x, qa_w_ref[...], preferred_element_type=jnp.float32)
    logits = logits + qa_b_ref[...].astype(jnp.float32)           # [BS, 128]
    out_ref[...] = logits.astype(out_ref.dtype)


def _rep_spec(arr):
    """Whole-array block, loaded once for the single grid step."""
    zeros = (0,) * arr.ndim
    return pl.BlockSpec(arr.shape, lambda i: zeros)


# ------------------------------ parameter init --------------------------------
def init_params(key):
    keys = iter(jax.random.split(key, 8))

    def normal(shape, std=0.02):
        return (std * jax.random.normal(next(keys), shape)).astype(jnp.float32)

    return {
        "word_emb": normal((VOCAB, HIDDEN)),
        "pos_emb": normal((MAX_POS, HIDDEN)),
        "emb_ln_g": jnp.ones((1, HIDDEN), jnp.float32),
        "emb_ln_b": jnp.zeros((1, HIDDEN), jnp.float32),
        # Fused QKV weights/biases, stacked over layers.
        "wqkv": normal((N_LAYERS, HIDDEN, 3 * HIDDEN)),
        "bqkv": jnp.zeros((N_LAYERS, 1, 3 * HIDDEN), jnp.float32),
        "wo": normal((N_LAYERS, HIDDEN, HIDDEN)),
        "bo": jnp.zeros((N_LAYERS, 1, HIDDEN), jnp.float32),
        "ln1_g": jnp.ones((N_LAYERS, 1, HIDDEN), jnp.float32),
        "ln1_b": jnp.zeros((N_LAYERS, 1, HIDDEN), jnp.float32),
        "w1": normal((N_LAYERS, HIDDEN, FFN_DIM)),
        "b1": jnp.zeros((N_LAYERS, 1, FFN_DIM), jnp.float32),
        "w2": normal((N_LAYERS, FFN_DIM, HIDDEN)),
        "b2": jnp.zeros((N_LAYERS, 1, HIDDEN), jnp.float32),
        "ln2_g": jnp.ones((N_LAYERS, 1, HIDDEN), jnp.float32),
        "ln2_b": jnp.zeros((N_LAYERS, 1, HIDDEN), jnp.float32),
        "qa_w": normal((HIDDEN, 2)),
        "qa_b": jnp.zeros((1, 2), jnp.float32),
    }


# ------------------------------- forward pass ---------------------------------
def forward(params, input_ids, attention_mask):
    B, S = input_ids.shape
    ids = input_ids.reshape(B * S, 1).astype(jnp.int32)
    mask = attention_mask.astype(jnp.float32)                  # [B, S]
    pos = params["pos_emb"][:S]                                 # static slice, free

    # Pad the QA head to 128 output lanes so the kernel's only store is
    # lane-dense (unmasked vst); real logits live in columns 0 and 1.
    qa_w_pad = jnp.zeros((HIDDEN, OUT_PAD), jnp.float32).at[:, :2].set(params["qa_w"])
    qa_b_pad = jnp.zeros((1, OUT_PAD), jnp.float32).at[:, :2].set(params["qa_b"])

    weights = [
        params["word_emb"], pos,
        params["emb_ln_g"], params["emb_ln_b"],
        params["wqkv"], params["bqkv"], params["wo"], params["bo"],
        params["ln1_g"], params["ln1_b"], params["w1"], params["b1"],
        params["w2"], params["b2"], params["ln2_g"], params["ln2_b"],
        qa_w_pad, qa_b_pad,
    ]

    logits_pad = pl.pallas_call(
        _fused_forward_kernel,
        out_shape=jax.ShapeDtypeStruct((B * S, OUT_PAD), jnp.float32),
        grid=(1,),                                              # single fused step
        in_specs=[
            pl.BlockSpec((B * S, 1), lambda i: (0, 0)),         # token ids
            pl.BlockSpec((B, S), lambda i: (0, 0)),             # attention mask
        ] + [_rep_spec(w) for w in weights],
        out_specs=pl.BlockSpec((B * S, OUT_PAD), lambda i: (0, 0)),
        compiler_params=pltpu.CompilerParams(
            dimension_semantics=("arbitrary",)),
    )(ids, mask, *weights)

    logits = logits_pad.reshape(B, S, OUT_PAD)
    start_logits = logits[..., 0]   # [B, S]
    end_logits = logits[..., 1]     # [B, S]
    # Reference forward returns the base model's outputs (the fine-tune branch
    # is computed but discarded there, and is undefined in the snippet).
    return {"start_logits": start_logits, "end_logits": end_logits}


# ------------------------------------ main -------------------------------------
if __name__ == "__main__":
    key = jax.random.PRNGKey(0)
    k_ids, k_params = jax.random.split(key)
    input_ids = jax.random.randint(k_ids, (BATCH, SEQ), 0, VOCAB, dtype=jnp.int32)
    attention_mask = jnp.ones((BATCH, SEQ), dtype=jnp.float32)
    params = init_params(k_params)

    out = jax.jit(forward)(params, input_ids, attention_mask)
    jax.block_until_ready(out)
    assert out["start_logits"].shape == (BATCH, SEQ)
    assert out["end_logits"].shape == (BATCH, SEQ)
    assert bool(jnp.all(jnp.isfinite(out["start_logits"])))
    assert bool(jnp.all(jnp.isfinite(out["end_logits"])))
    print("KERNEL_OK")
</pallas_src>

<mosaic_0001>
module attributes {stable_mosaic.version = 11 : i64} {
  func.func @_fused_forward_kernel(%arg0: i32, %arg1: memref<16x1xi32, #tpu.memory_space<vmem>>, %arg2: memref<2x8xf32, #tpu.memory_space<vmem>>, %arg3: memref<64x32xf32, #tpu.memory_space<vmem>>, %arg4: memref<8x32xf32, #tpu.memory_space<vmem>>, %arg5: memref<1x32xf32, #tpu.memory_space<vmem>>, %arg6: memref<1x32xf32, #tpu.memory_space<vmem>>, %arg7: memref<2x32x96xf32, #tpu.memory_space<vmem>>, %arg8: memref<2x1x96xf32, #tpu.memory_space<vmem>>, %arg9: memref<2x32x32xf32, #tpu.memory_space<vmem>>, %arg10: memref<2x1x32xf32, #tpu.memory_space<vmem>>, %arg11: memref<2x1x32xf32, #tpu.memory_space<vmem>>, %arg12: memref<2x1x32xf32, #tpu.memory_space<vmem>>, %arg13: memref<2x32x64xf32, #tpu.memory_space<vmem>>, %arg14: memref<2x1x64xf32, #tpu.memory_space<vmem>>, %arg15: memref<2x64x32xf32, #tpu.memory_space<vmem>>, %arg16: memref<2x1x32xf32, #tpu.memory_space<vmem>>, %arg17: memref<2x1x32xf32, #tpu.memory_space<vmem>>, %arg18: memref<2x1x32xf32, #tpu.memory_space<vmem>>, %arg19: memref<32x128xf32, #tpu.memory_space<vmem>>, %arg20: memref<1x128xf32, #tpu.memory_space<vmem>>, %arg21: memref<16x128xf32, #tpu.memory_space<vmem>>) attributes {dimension_semantics = [#tpu.dimension_semantics<arbitrary>], iteration_bounds = array<i64: 1>, scalar_prefetch = 0 : i64, scratch_operands = 0 : i64, tpu.core_type = #tpu.core_type<tc>, window_params = [{pipeline_mode = #tpu.pipeline_mode<synchronous>, transform_indices = @transform_0, window_bounds = array<i64: 16, 1>}, {pipeline_mode = #tpu.pipeline_mode<synchronous>, transform_indices = @transform_1, window_bounds = array<i64: 2, 8>}, {pipeline_mode = #tpu.pipeline_mode<synchronous>, transform_indices = @transform_2, window_bounds = array<i64: 64, 32>}, {pipeline_mode = #tpu.pipeline_mode<synchronous>, transform_indices = @transform_3, window_bounds = array<i64: 8, 32>}, {pipeline_mode = #tpu.pipeline_mode<synchronous>, transform_indices = @transform_4, window_bounds = array<i64: 1, 32>}, {pipeline_mode = #tpu.pipeline_mode<synchronous>, transform_indices = @transform_5, window_bounds = array<i64: 1, 32>}, {pipeline_mode = #tpu.pipeline_mode<synchronous>, transform_indices = @transform_6, window_bounds = array<i64: 2, 32, 96>}, {pipeline_mode = #tpu.pipeline_mode<synchronous>, transform_indices = @transform_7, window_bounds = array<i64: 2, 1, 96>}, {pipeline_mode = #tpu.pipeline_mode<synchronous>, transform_indices = @transform_8, window_bounds = array<i64: 2, 32, 32>}, {pipeline_mode = #tpu.pipeline_mode<synchronous>, transform_indices = @transform_9, window_bounds = array<i64: 2, 1, 32>}, {pipeline_mode = #tpu.pipeline_mode<synchronous>, transform_indices = @transform_10, window_bounds = array<i64: 2, 1, 32>}, {pipeline_mode = #tpu.pipeline_mode<synchronous>, transform_indices = @transform_11, window_bounds = array<i64: 2, 1, 32>}, {pipeline_mode = #tpu.pipeline_mode<synchronous>, transform_indices = @transform_12, window_bounds = array<i64: 2, 32, 64>}, {pipeline_mode = #tpu.pipeline_mode<synchronous>, transform_indices = @transform_13, window_bounds = array<i64: 2, 1, 64>}, {pipeline_mode = #tpu.pipeline_mode<synchronous>, transform_indices = @transform_14, window_bounds = array<i64: 2, 64, 32>}, {pipeline_mode = #tpu.pipeline_mode<synchronous>, transform_indices = @transform_15, window_bounds = array<i64: 2, 1, 32>}, {pipeline_mode = #tpu.pipeline_mode<synchronous>, transform_indices = @transform_16, window_bounds = array<i64: 2, 1, 32>}, {pipeline_mode = #tpu.pipeline_mode<synchronous>, transform_indices = @transform_17, window_bounds = array<i64: 2, 1, 32>}, {pipeline_mode = #tpu.pipeline_mode<synchronous>, transform_indices = @transform_18, window_bounds = array<i64: 32, 128>}, {pipeline_mode = #tpu.pipeline_mode<synchronous>, transform_indices = @transform_19, window_bounds = array<i64: 1, 128>}, {pipeline_mode = #tpu.pipeline_mode<synchronous>, transform_indices = @transform_20, window_bounds = array<i64: 16, 128>}]} {
    %c0 = arith.constant 0 : index
    %c0_0 = arith.constant 0 : index
    %0 = vector.load %arg1[%c0, %c0_0] : memref<16x1xi32, #tpu.memory_space<vmem>>, vector<16x1xi32>
    %1 = tpu.iota {dimensions = array<i32: 1>} : vector<16x64xi32>
    %2 = vector.broadcast %0 : vector<16x1xi32> to vector<16x64xi32>
    %3 = arith.cmpi eq, %1, %2 : vector<16x64xi32>
    %4 = arith.extui %3 : vector<16x64xi1> to vector<16x64xi32>
    %5 = arith.sitofp %4 : vector<16x64xi32> to vector<16x64xf32>
    %c0_1 = arith.constant 0 : index
    %c0_2 = arith.constant 0 : index
    %6 = vector.load %arg3[%c0_1, %c0_2] : memref<64x32xf32, #tpu.memory_space<vmem>>, vector<64x32xf32>
    %cst = arith.constant dense<0.000000e+00> : vector<16x32xf32>
    %7 = tpu.matmul %5, %6, %cst {dimension_numbers = #tpu.dot_dimension_numbers<[1], [0], [0], [1], [0, 0, 1, 1], [], []>} : vector<16x64xf32>, vector<64x32xf32>, vector<16x32xf32> -> vector<16x32xf32>
    %c0_3 = arith.constant 0 : index
    %c0_4 = arith.constant 0 : index
    %8 = vector.load %arg4[%c0_3, %c0_4] : memref<8x32xf32, #tpu.memory_space<vmem>>, vector<8x32xf32>
    %9 = tpu.concatenate %8, %8 in 0 : vector<8x32xf32>, vector<8x32xf32> -> vector<16x32xf32>
    %10 = arith.addf %7, %9 : vector<16x32xf32>
    %c0_5 = arith.constant 0 : index
    %c0_6 = arith.constant 0 : index
    %11 = vector.load %arg5[%c0_5, %c0_6] : memref<1x32xf32, #tpu.memory_space<vmem>>, vector<1x32xf32>
    %c0_7 = arith.constant 0 : index
    %c0_8 = arith.constant 0 : index
    %12 = vector.load %arg6[%c0_7, %c0_8] : memref<1x32xf32, #tpu.memory_space<vmem>>, vector<1x32xf32>
    %cst_9 = arith.constant dense<0.000000e+00> : vector<16xf32>
    %13 = vector.multi_reduction <add>, %10, %cst_9 [1] : vector<16x32xf32> to vector<16xf32>
    %14 = vector.shape_cast %13 : vector<16xf32> to vector<16x1xf32>
    %cst_10 = arith.constant 3.200000e+01 : f32
    %15 = vector.broadcast %cst_10 : f32 to vector<16x1xf32>
    %16 = arith.divf %14, %15 : vector<16x1xf32>
    %17 = vector.broadcast %16 : vector<16x1xf32> to vector<16x32xf32>
    %18 = arith.subf %10, %17 : vector<16x32xf32>
    %19 = arith.mulf %18, %18 : vector<16x32xf32>
    %cst_11 = arith.constant dense<0.000000e+00> : vector<16xf32>
    %20 = vector.multi_reduction <add>, %19, %cst_11 [1] : vector<16x32xf32> to vector<16xf32>
    %21 = vector.shape_cast %20 : vector<16xf32> to vector<16x1xf32>
    %cst_12 = arith.constant 3.200000e+01 : f32
    %22 = vector.broadcast %cst_12 : f32 to vector<16x1xf32>
    %23 = arith.divf %21, %22 : vector<16x1xf32>
    %24 = vector.broadcast %16 : vector<16x1xf32> to vector<16x32xf32>
    %25 = arith.subf %10, %24 : vector<16x32xf32>
    %cst_13 = arith.constant 9.99999996E-13 : f32
    %26 = vector.broadcast %cst_13 : f32 to vector<16x1xf32>
    %27 = arith.addf %23, %26 : vector<16x1xf32>
    %28 = math.rsqrt %27 : vector<16x1xf32>
    %29 = vector.broadcast %28 : vector<16x1xf32> to vector<16x32xf32>
    %30 = arith.mulf %25, %29 : vector<16x32xf32>
    %31 = vector.broadcast %11 : vector<1x32xf32> to vector<16x32xf32>
    %32 = arith.mulf %30, %31 : vector<16x32xf32>
    %33 = vector.broadcast %12 : vector<1x32xf32> to vector<16x32xf32>
    %34 = arith.addf %32, %33 : vector<16x32xf32>
    %c0_14 = arith.constant 0 : index
    %c0_15 = arith.constant 0 : index
    %35 = vector.load %arg2[%c0_14, %c0_15] : memref<2x8xf32, #tpu.memory_space<vmem>>, vector<2x8xf32>
    %cst_16 = arith.constant 1.000000e+00 : f32
    %36 = vector.broadcast %cst_16 : f32 to vector<2x8xf32>
    %37 = arith.subf %36, %35 : vector<2x8xf32>
    %cst_17 = arith.constant -1.000000e+09 : f32
    %38 = vector.broadcast %cst_17 : f32 to vector<2x8xf32>
    %39 = arith.mulf %37, %38 : vector<2x8xf32>
    %40 = vector.extract_strided_slice %39 {offsets = [0, 0], sizes = [1, 8], strides = [1, 1]} : vector<2x8xf32> to vector<1x8xf32>
    %41 = vector.shape_cast %40 : vector<1x8xf32> to vector<1x8xf32>
    %42 = vector.broadcast %41 : vector<1x8xf32> to vector<8x8xf32>
    %43 = vector.extract_strided_slice %39 {offsets = [0, 0], sizes = [1, 8], strides = [1, 1]} : vector<2x8xf32> to vector<1x8xf32>
    %44 = vector.shape_cast %43 : vector<1x8xf32> to vector<1x8xf32>
    %45 = vector.broadcast %44 : vector<1x8xf32> to vector<8x8xf32>
    %46 = vector.extract_strided_slice %39 {offsets = [1, 0], sizes = [1, 8], strides = [1, 1]} : vector<2x8xf32> to vector<1x8xf32>
    %47 = vector.shape_cast %46 : vector<1x8xf32> to vector<1x8xf32>
    %48 = vector.broadcast %47 : vector<1x8xf32> to vector<8x8xf32>
    %49 = vector.extract_strided_slice %39 {offsets = [1, 0], sizes = [1, 8], strides = [1, 1]} : vector<2x8xf32> to vector<1x8xf32>
    %50 = vector.shape_cast %49 : vector<1x8xf32> to vector<1x8xf32>
    %51 = vector.broadcast %50 : vector<1x8xf32> to vector<8x8xf32>
    %52 = vector.shape_cast %42 : vector<8x8xf32> to vector<1x8x8xf32>
    %53 = vector.shape_cast %45 : vector<8x8xf32> to vector<1x8x8xf32>
    %54 = vector.shape_cast %48 : vector<8x8xf32> to vector<1x8x8xf32>
    %55 = vector.shape_cast %51 : vector<8x8xf32> to vector<1x8x8xf32>
    %56 = tpu.concatenate %52, %53, %54, %55 in 0 : vector<1x8x8xf32>, vector<1x8x8xf32>, vector<1x8x8xf32>, vector<1x8x8xf32> -> vector<4x8x8xf32>
    %c0_18 = arith.constant 0 : index
    %c0_19 = arith.constant 0 : index
    %c0_20 = arith.constant 0 : index
    %57 = vector.load %arg7[%c0_18, %c0_19, %c0_20] : memref<2x32x96xf32, #tpu.memory_space<vmem>>, vector<1x32x96xf32>
    %58 = vector.shape_cast %57 : vector<1x32x96xf32> to vector<32x96xf32>
    %cst_21 = arith.constant dense<0.000000e+00> : vector<16x96xf32>
    %59 = tpu.matmul %34, %58, %cst_21 {dimension_numbers = #tpu.dot_dimension_numbers<[1], [0], [0], [1], [0, 0, 1, 1], [], []>} : vector<16x32xf32>, vector<32x96xf32>, vector<16x96xf32> -> vector<16x96xf32>
    %c0_22 = arith.constant 0 : index
    %c0_23 = arith.constant 0 : index
    %c0_24 = arith.constant 0 : index
    %60 = vector.load %arg8[%c0_22, %c0_23, %c0_24] : memref<2x1x96xf32, #tpu.memory_space<vmem>>, vector<1x1x96xf32>
    %61 = vector.shape_cast %60 : vector<1x1x96xf32> to vector<1x96xf32>
    %62 = vector.broadcast %61 : vector<1x96xf32> to vector<16x96xf32>
    %63 = arith.addf %59, %62 : vector<16x96xf32>
    %64 = vector.extract_strided_slice %63 {offsets = [0, 0], sizes = [8, 16], strides = [1, 1]} : vector<16x96xf32> to vector<8x16xf32>
    %65 = vector.extract_strided_slice %63 {offsets = [0, 16], sizes = [8, 16], strides = [1, 1]} : vector<16x96xf32> to vector<8x16xf32>
    %66 = vector.extract_strided_slice %63 {offsets = [8, 0], sizes = [8, 16], strides = [1, 1]} : vector<16x96xf32> to vector<8x16xf32>
    %67 = vector.extract_strided_slice %63 {offsets = [8, 16], sizes = [8, 16], strides = [1, 1]} : vector<16x96xf32> to vector<8x16xf32>
    %68 = vector.shape_cast %64 : vector<8x16xf32> to vector<1x8x16xf32>
    %69 = vector.shape_cast %65 : vector<8x16xf32> to vector<1x8x16xf32>
    %70 = vector.shape_cast %66 : vector<8x16xf32> to vector<1x8x16xf32>
    %71 = vector.shape_cast %67 : vector<8x16xf32> to vector<1x8x16xf32>
    %72 = tpu.concatenate %68, %69, %70, %71 in 0 : vector<1x8x16xf32>, vector<1x8x16xf32>, vector<1x8x16xf32>, vector<1x8x16xf32> -> vector<4x8x16xf32>
    %73 = vector.extract_strided_slice %63 {offsets = [0, 32], sizes = [8, 16], strides = [1, 1]} : vector<16x96xf32> to vector<8x16xf32>
    %74 = vector.extract_strided_slice %63 {offsets = [0, 48], sizes = [8, 16], strides = [1, 1]} : vector<16x96xf32> to vector<8x16xf32>
    %75 = vector.extract_strided_slice %63 {offsets = [8, 32], sizes = [8, 16], strides = [1, 1]} : vector<16x96xf32> to vector<8x16xf32>
    %76 = vector.extract_strided_slice %63 {offsets = [8, 48], sizes = [8, 16], strides = [1, 1]} : vector<16x96xf32> to vector<8x16xf32>
    %77 = vector.shape_cast %73 : vector<8x16xf32> to vector<1x8x16xf32>
    %78 = vector.shape_cast %74 : vector<8x16xf32> to vector<1x8x16xf32>
    %79 = vector.shape_cast %75 : vector<8x16xf32> to vector<1x8x16xf32>
    %80 = vector.shape_cast %76 : vector<8x16xf32> to vector<1x8x16xf32>
    %81 = tpu.concatenate %77, %78, %79, %80 in 0 : vector<1x8x16xf32>, vector<1x8x16xf32>, vector<1x8x16xf32>, vector<1x8x16xf32> -> vector<4x8x16xf32>
    %82 = vector.extract_strided_slice %63 {offsets = [0, 64], sizes = [8, 16], strides = [1, 1]} : vector<16x96xf32> to vector<8x16xf32>
    %83 = vector.extract_strided_slice %63 {offsets = [0, 80], sizes = [8, 16], strides = [1, 1]} : vector<16x96xf32> to vector<8x16xf32>
    %84 = vector.extract_strided_slice %63 {offsets = [8, 64], sizes = [8, 16], strides = [1, 1]} : vector<16x96xf32> to vector<8x16xf32>
    %85 = vector.extract_strided_slice %63 {offsets = [8, 80], sizes = [8, 16], strides = [1, 1]} : vector<16x96xf32> to vector<8x16xf32>
    %86 = vector.shape_cast %82 : vector<8x16xf32> to vector<1x8x16xf32>
    %87 = vector.shape_cast %83 : vector<8x16xf32> to vector<1x8x16xf32>
    %88 = vector.shape_cast %84 : vector<8x16xf32> to vector<1x8x16xf32>
    %89 = vector.shape_cast %85 : vector<8x16xf32> to vector<1x8x16xf32>
    %90 = tpu.concatenate %86, %87, %88, %89 in 0 : vector<1x8x16xf32>, vector<1x8x16xf32>, vector<1x8x16xf32>, vector<1x8x16xf32> -> vector<4x8x16xf32>
    "tpu.trace_start"() <{level = 10 : i32, message = "nqd,nkd->nqk"}> : () -> ()
    %cst_25 = arith.constant dense<0.000000e+00> : vector<4x8x8xf32>
    %91 = tpu.matmul %72, %81, %cst_25 {dimension_numbers = #tpu.dot_dimension_numbers<[2], [2], [1], [1], [0, 0, 0, 1, 1, 1], [0], [0]>} : vector<4x8x16xf32>, vector<4x8x16xf32>, vector<4x8x8xf32> -> vector<4x8x8xf32>
    "tpu.trace_stop"() : () -> ()
    %cst_26 = arith.constant 2.500000e-01 : f32
    %92 = vector.broadcast %cst_26 : f32 to vector<4x8x8xf32>
    %93 = arith.mulf %91, %92 : vector<4x8x8xf32>
    %94 = arith.addf %93, %56 : vector<4x8x8xf32>
    %cst_27 = arith.constant dense<0xFF800000> : vector<4x8xf32>
    %95 = vector.multi_reduction <maximumf>, %94, %cst_27 [2] : vector<4x8x8xf32> to vector<4x8xf32>
    %96 = vector.shape_cast %95 : vector<4x8xf32> to vector<4x8x1xf32>
    %97 = vector.broadcast %96 : vector<4x8x1xf32> to vector<4x8x8xf32>
    %98 = arith.subf %94, %97 : vector<4x8x8xf32>
    %99 = math.exp %98 : vector<4x8x8xf32>
    %cst_28 = arith.constant dense<0.000000e+00> : vector<4x8xf32>
    %100 = vector.multi_reduction <add>, %99, %cst_28 [2] : vector<4x8x8xf32> to vector<4x8xf32>
    %101 = vector.shape_cast %100 : vector<4x8xf32> to vector<4x8x1xf32>
    %102 = tpu.reciprocal %101 {approx = true} : vector<4x8x1xf32> -> vector<4x8x1xf32>
    %103 = vector.broadcast %102 : vector<4x8x1xf32> to vector<4x8x8xf32>
    %104 = arith.mulf %99, %103 : vector<4x8x8xf32>
    "tpu.trace_start"() <{level = 10 : i32, message = "nqk,nkd->nqd"}> : () -> ()
    %cst_29 = arith.constant dense<0.000000e+00> : vector<4x8x16xf32>
    %105 = tpu.matmul %104, %90, %cst_29 {dimension_numbers = #tpu.dot_dimension_numbers<[2], [1], [1], [2], [0, 0, 0, 1, 1, 2], [0], [0]>} : vector<4x8x8xf32>, vector<4x8x16xf32>, vector<4x8x16xf32> -> vector<4x8x16xf32>
    "tpu.trace_stop"() : () -> ()
    %106 = vector.extract_strided_slice %105 {offsets = [0, 0, 0], sizes = [1, 8, 16], strides = [1, 1, 1]} : vector<4x8x16xf32> to vector<1x8x16xf32>
    %107 = vector.shape_cast %106 : vector<1x8x16xf32> to vector<8x16xf32>
    %108 = vector.extract_strided_slice %105 {offsets = [1, 0, 0], sizes = [1, 8, 16], strides = [1, 1, 1]} : vector<4x8x16xf32> to vector<1x8x16xf32>
    %109 = vector.shape_cast %108 : vector<1x8x16xf32> to vector<8x16xf32>
    %110 = tpu.concatenate %107, %109 in 1 : vector<8x16xf32>, vector<8x16xf32> -> vector<8x32xf32>
    %111 = vector.extract_strided_slice %105 {offsets = [2, 0, 0], sizes = [1, 8, 16], strides = [1, 1, 1]} : vector<4x8x16xf32> to vector<1x8x16xf32>
    %112 = vector.shape_cast %111 : vector<1x8x16xf32> to vector<8x16xf32>
    %113 = vector.extract_strided_slice %105 {offsets = [3, 0, 0], sizes = [1, 8, 16], strides = [1, 1, 1]} : vector<4x8x16xf32> to vector<1x8x16xf32>
    %114 = vector.shape_cast %113 : vector<1x8x16xf32> to vector<8x16xf32>
    %115 = tpu.concatenate %112, %114 in 1 : vector<8x16xf32>, vector<8x16xf32> -> vector<8x32xf32>
    %116 = tpu.concatenate %110, %115 in 0 : vector<8x32xf32>, vector<8x32xf32> -> vector<16x32xf32>
    %c0_30 = arith.constant 0 : index
    %c0_31 = arith.constant 0 : index
    %c0_32 = arith.constant 0 : index
    %117 = vector.load %arg9[%c0_30, %c0_31, %c0_32] : memref<2x32x32xf32, #tpu.memory_space<vmem>>, vector<1x32x32xf32>
    %118 = vector.shape_cast %117 : vector<1x32x32xf32> to vector<32x32xf32>
    %cst_33 = arith.constant dense<0.000000e+00> : vector<16x32xf32>
    %119 = tpu.matmul %116, %118, %cst_33 {dimension_numbers = #tpu.dot_dimension_numbers<[1], [0], [0], [1], [0, 0, 1, 1], [], []>} : vector<16x32xf32>, vector<32x32xf32>, vector<16x32xf32> -> vector<16x32xf32>
    %c0_34 = arith.constant 0 : index
    %c0_35 = arith.constant 0 : index
    %c0_36 = arith.constant 0 : index
    %120 = vector.load %arg10[%c0_34, %c0_35, %c0_36] : memref<2x1x32xf32, #tpu.memory_space<vmem>>, vector<1x1x32xf32>
    %121 = vector.shape_cast %120 : vector<1x1x32xf32> to vector<1x32xf32>
    %122 = vector.broadcast %121 : vector<1x32xf32> to vector<16x32xf32>
    %123 = arith.addf %119, %122 : vector<16x32xf32>
    %124 = arith.addf %34, %123 : vector<16x32xf32>
    %c0_37 = arith.constant 0 : index
    %c0_38 = arith.constant 0 : index
    %c0_39 = arith.constant 0 : index
    %125 = vector.load %arg11[%c0_37, %c0_38, %c0_39] : memref<2x1x32xf32, #tpu.memory_space<vmem>>, vector<1x1x32xf32>
    %126 = vector.shape_cast %125 : vector<1x1x32xf32> to vector<1x32xf32>
    %c0_40 = arith.constant 0 : index
    %c0_41 = arith.constant 0 : index
    %c0_42 = arith.constant 0 : index
    %127 = vector.load %arg12[%c0_40, %c0_41, %c0_42] : memref<2x1x32xf32, #tpu.memory_space<vmem>>, vector<1x1x32xf32>
    %128 = vector.shape_cast %127 : vector<1x1x32xf32> to vector<1x32xf32>
    %cst_43 = arith.constant dense<0.000000e+00> : vector<16xf32>
    %129 = vector.multi_reduction <add>, %124, %cst_43 [1] : vector<16x32xf32> to vector<16xf32>
    %130 = vector.shape_cast %129 : vector<16xf32> to vector<16x1xf32>
    %cst_44 = arith.constant 3.200000e+01 : f32
    %131 = vector.broadcast %cst_44 : f32 to vector<16x1xf32>
    %132 = arith.divf %130, %131 : vector<16x1xf32>
    %133 = vector.broadcast %132 : vector<16x1xf32> to vector<16x32xf32>
    %134 = arith.subf %124, %133 : vector<16x32xf32>
    %135 = arith.mulf %134, %134 : vector<16x32xf32>
    %cst_45 = arith.constant dense<0.000000e+00> : vector<16xf32>
    %136 = vector.multi_reduction <add>, %135, %cst_45 [1] : vector<16x32xf32> to vector<16xf32>
    %137 = vector.shape_cast %136 : vector<16xf32> to vector<16x1xf32>
    %cst_46 = arith.constant 3.200000e+01 : f32
    %138 = vector.broadcast %cst_46 : f32 to vector<16x1xf32>
    %139 = arith.divf %137, %138 : vector<16x1xf32>
    %140 = vector.broadcast %132 : vector<16x1xf32> to vector<16x32xf32>
    %141 = arith.subf %124, %140 : vector<16x32xf32>
    %cst_47 = arith.constant 9.99999996E-13 : f32
    %142 = vector.broadcast %cst_47 : f32 to vector<16x1xf32>
    %143 = arith.addf %139, %142 : vector<16x1xf32>
    %144 = math.rsqrt %143 : vector<16x1xf32>
    %145 = vector.broadcast %144 : vector<16x1xf32> to vector<16x32xf32>
    %146 = arith.mulf %141, %145 : vector<16x32xf32>
    %147 = vector.broadcast %126 : vector<1x32xf32> to vector<16x32xf32>
    %148 = arith.mulf %146, %147 : vector<16x32xf32>
    %149 = vector.broadcast %128 : vector<1x32xf32> to vector<16x32xf32>
    %150 = arith.addf %148, %149 : vector<16x32xf32>
    %c0_48 = arith.constant 0 : index
    %c0_49 = arith.constant 0 : index
    %c0_50 = arith.constant 0 : index
    %151 = vector.load %arg13[%c0_48, %c0_49, %c0_50] : memref<2x32x64xf32, #tpu.memory_space<vmem>>, vector<1x32x64xf32>
    %152 = vector.shape_cast %151 : vector<1x32x64xf32> to vector<32x64xf32>
    %cst_51 = arith.constant dense<0.000000e+00> : vector<16x64xf32>
    %153 = tpu.matmul %150, %152, %cst_51 {dimension_numbers = #tpu.dot_dimension_numbers<[1], [0], [0], [1], [0, 0, 1, 1], [], []>} : vector<16x32xf32>, vector<32x64xf32>, vector<16x64xf32> -> vector<16x64xf32>
    %c0_52 = arith.constant 0 : index
    %c0_53 = arith.constant 0 : index
    %c0_54 = arith.constant 0 : index
    %154 = vector.load %arg14[%c0_52, %c0_53, %c0_54] : memref<2x1x64xf32, #tpu.memory_space<vmem>>, vector<1x1x64xf32>
    %155 = vector.shape_cast %154 : vector<1x1x64xf32> to vector<1x64xf32>
    %156 = vector.broadcast %155 : vector<1x64xf32> to vector<16x64xf32>
    %157 = arith.addf %153, %156 : vector<16x64xf32>
    %cst_55 = arith.constant 5.000000e-01 : f32
    %158 = vector.broadcast %cst_55 : f32 to vector<16x64xf32>
    %159 = arith.mulf %158, %157 : vector<16x64xf32>
    %cst_56 = arith.constant 4.471500e-02 : f32
    %160 = vector.broadcast %cst_56 : f32 to vector<16x64xf32>
    %161 = arith.mulf %160, %157 : vector<16x64xf32>
    %162 = arith.mulf %161, %157 : vector<16x64xf32>
    %163 = arith.mulf %162, %157 : vector<16x64xf32>
    %164 = arith.addf %157, %163 : vector<16x64xf32>
    %cst_57 = arith.constant 0.797884583 : f32
    %165 = vector.broadcast %cst_57 : f32 to vector<16x64xf32>
    %166 = arith.mulf %165, %164 : vector<16x64xf32>
    %167 = math.tanh %166 : vector<16x64xf32>
    %cst_58 = arith.constant 1.000000e+00 : f32
    %168 = vector.broadcast %cst_58 : f32 to vector<16x64xf32>
    %169 = arith.addf %168, %167 : vector<16x64xf32>
    %170 = arith.mulf %159, %169 : vector<16x64xf32>
    %c0_59 = arith.constant 0 : index
    %c0_60 = arith.constant 0 : index
    %c0_61 = arith.constant 0 : index
    %171 = vector.load %arg15[%c0_59, %c0_60, %c0_61] : memref<2x64x32xf32, #tpu.memory_space<vmem>>, vector<1x64x32xf32>
    %172 = vector.shape_cast %171 : vector<1x64x32xf32> to vector<64x32xf32>
    %cst_62 = arith.constant dense<0.000000e+00> : vector<16x32xf32>
    %173 = tpu.matmul %170, %172, %cst_62 {dimension_numbers = #tpu.dot_dimension_numbers<[1], [0], [0], [1], [0, 0, 1, 1], [], []>} : vector<16x64xf32>, vector<64x32xf32>, vector<16x32xf32> -> vector<16x32xf32>
    %c0_63 = arith.constant 0 : index
    %c0_64 = arith.constant 0 : index
    %c0_65 = arith.constant 0 : index
    %174 = vector.load %arg16[%c0_63, %c0_64, %c0_65] : memref<2x1x32xf32, #tpu.memory_space<vmem>>, vector<1x1x32xf32>
    %175 = vector.shape_cast %174 : vector<1x1x32xf32> to vector<1x32xf32>
    %176 = vector.broadcast %175 : vector<1x32xf32> to vector<16x32xf32>
    %177 = arith.addf %173, %176 : vector<16x32xf32>
    %178 = arith.addf %150, %177 : vector<16x32xf32>
    %c0_66 = arith.constant 0 : index
    %c0_67 = arith.constant 0 : index
    %c0_68 = arith.constant 0 : index
    %179 = vector.load %arg17[%c0_66, %c0_67, %c0_68] : memref<2x1x32xf32, #tpu.memory_space<vmem>>, vector<1x1x32xf32>
    %180 = vector.shape_cast %179 : vector<1x1x32xf32> to vector<1x32xf32>
    %c0_69 = arith.constant 0 : index
    %c0_70 = arith.constant 0 : index
    %c0_71 = arith.constant 0 : index
    %181 = vector.load %arg18[%c0_69, %c0_70, %c0_71] : memref<2x1x32xf32, #tpu.memory_space<vmem>>, vector<1x1x32xf32>
    %182 = vector.shape_cast %181 : vector<1x1x32xf32> to vector<1x32xf32>
    %cst_72 = arith.constant dense<0.000000e+00> : vector<16xf32>
    %183 = vector.multi_reduction <add>, %178, %cst_72 [1] : vector<16x32xf32> to vector<16xf32>
    %184 = vector.shape_cast %183 : vector<16xf32> to vector<16x1xf32>
    %cst_73 = arith.constant 3.200000e+01 : f32
    %185 = vector.broadcast %cst_73 : f32 to vector<16x1xf32>
    %186 = arith.divf %184, %185 : vector<16x1xf32>
    %187 = vector.broadcast %186 : vector<16x1xf32> to vector<16x32xf32>
    %188 = arith.subf %178, %187 : vector<16x32xf32>
    %189 = arith.mulf %188, %188 : vector<16x32xf32>
    %cst_74 = arith.constant dense<0.000000e+00> : vector<16xf32>
    %190 = vector.multi_reduction <add>, %189, %cst_74 [1] : vector<16x32xf32> to vector<16xf32>
    %191 = vector.shape_cast %190 : vector<16xf32> to vector<16x1xf32>
    %cst_75 = arith.constant 3.200000e+01 : f32
    %192 = vector.broadcast %cst_75 : f32 to vector<16x1xf32>
    %193 = arith.divf %191, %192 : vector<16x1xf32>
    %194 = vector.broadcast %186 : vector<16x1xf32> to vector<16x32xf32>
    %195 = arith.subf %178, %194 : vector<16x32xf32>
    %cst_76 = arith.constant 9.99999996E-13 : f32
    %196 = vector.broadcast %cst_76 : f32 to vector<16x1xf32>
    %197 = arith.addf %193, %196 : vector<16x1xf32>
    %198 = math.rsqrt %197 : vector<16x1xf32>
    %199 = vector.broadcast %198 : vector<16x1xf32> to vector<16x32xf32>
    %200 = arith.mulf %195, %199 : vector<16x32xf32>
    %201 = vector.broadcast %180 : vector<1x32xf32> to vector<16x32xf32>
    %202 = arith.mulf %200, %201 : vector<16x32xf32>
    %203 = vector.broadcast %182 : vector<1x32xf32> to vector<16x32xf32>
    %204 = arith.addf %202, %203 : vector<16x32xf32>
    %c1 = arith.constant 1 : index
    %c0_77 = arith.constant 0 : index
    %c0_78 = arith.constant 0 : index
    %205 = vector.load %arg7[%c1, %c0_77, %c0_78] : memref<2x32x96xf32, #tpu.memory_space<vmem>>, vector<1x32x96xf32>
    %206 = vector.shape_cast %205 : vector<1x32x96xf32> to vector<32x96xf32>
    %cst_79 = arith.constant dense<0.000000e+00> : vector<16x96xf32>
    %207 = tpu.matmul %204, %206, %cst_79 {dimension_numbers = #tpu.dot_dimension_numbers<[1], [0], [0], [1], [0, 0, 1, 1], [], []>} : vector<16x32xf32>, vector<32x96xf32>, vector<16x96xf32> -> vector<16x96xf32>
    %c1_80 = arith.constant 1 : index
    %c0_81 = arith.constant 0 : index
    %c0_82 = arith.constant 0 : index
    %208 = vector.load %arg8[%c1_80, %c0_81, %c0_82] : memref<2x1x96xf32, #tpu.memory_space<vmem>>, vector<1x1x96xf32>
    %209 = vector.shape_cast %208 : vector<1x1x96xf32> to vector<1x96xf32>
    %210 = vector.broadcast %209 : vector<1x96xf32> to vector<16x96xf32>
    %211 = arith.addf %207, %210 : vector<16x96xf32>
    %212 = vector.extract_strided_slice %211 {offsets = [0, 0], sizes = [8, 16], strides = [1, 1]} : vector<16x96xf32> to vector<8x16xf32>
    %213 = vector.extract_strided_slice %211 {offsets = [0, 16], sizes = [8, 16], strides = [1, 1]} : vector<16x96xf32> to vector<8x16xf32>
    %214 = vector.extract_strided_slice %211 {offsets = [8, 0], sizes = [8, 16], strides = [1, 1]} : vector<16x96xf32> to vector<8x16xf32>
    %215 = vector.extract_strided_slice %211 {offsets = [8, 16], sizes = [8, 16], strides = [1, 1]} : vector<16x96xf32> to vector<8x16xf32>
    %216 = vector.shape_cast %212 : vector<8x16xf32> to vector<1x8x16xf32>
    %217 = vector.shape_cast %213 : vector<8x16xf32> to vector<1x8x16xf32>
    %218 = vector.shape_cast %214 : vector<8x16xf32> to vector<1x8x16xf32>
    %219 = vector.shape_cast %215 : vector<8x16xf32> to vector<1x8x16xf32>
    %220 = tpu.concatenate %216, %217, %218, %219 in 0 : vector<1x8x16xf32>, vector<1x8x16xf32>, vector<1x8x16xf32>, vector<1x8x16xf32> -> vector<4x8x16xf32>
    %221 = vector.extract_strided_slice %211 {offsets = [0, 32], sizes = [8, 16], strides = [1, 1]} : vector<16x96xf32> to vector<8x16xf32>
    %222 = vector.extract_strided_slice %211 {offsets = [0, 48], sizes = [8, 16], strides = [1, 1]} : vector<16x96xf32> to vector<8x16xf32>
    %223 = vector.extract_strided_slice %211 {offsets = [8, 32], sizes = [8, 16], strides = [1, 1]} : vector<16x96xf32> to vector<8x16xf32>
    %224 = vector.extract_strided_slice %211 {offsets = [8, 48], sizes = [8, 16], strides = [1, 1]} : vector<16x96xf32> to vector<8x16xf32>
    %225 = vector.shape_cast %221 : vector<8x16xf32> to vector<1x8x16xf32>
    %226 = vector.shape_cast %222 : vector<8x16xf32> to vector<1x8x16xf32>
    %227 = vector.shape_cast %223 : vector<8x16xf32> to vector<1x8x16xf32>
    %228 = vector.shape_cast %224 : vector<8x16xf32> to vector<1x8x16xf32>
    %229 = tpu.concatenate %225, %226, %227, %228 in 0 : vector<1x8x16xf32>, vector<1x8x16xf32>, vector<1x8x16xf32>, vector<1x8x16xf32> -> vector<4x8x16xf32>
    %230 = vector.extract_strided_slice %211 {offsets = [0, 64], sizes = [8, 16], strides = [1, 1]} : vector<16x96xf32> to vector<8x16xf32>
    %231 = vector.extract_strided_slice %211 {offsets = [0, 80], sizes = [8, 16], strides = [1, 1]} : vector<16x96xf32> to vector<8x16xf32>
    %232 = vector.extract_strided_slice %211 {offsets = [8, 64], sizes = [8, 16], strides = [1, 1]} : vector<16x96xf32> to vector<8x16xf32>
    %233 = vector.extract_strided_slice %211 {offsets = [8, 80], sizes = [8, 16], strides = [1, 1]} : vector<16x96xf32> to vector<8x16xf32>
    %234 = vector.shape_cast %230 : vector<8x16xf32> to vector<1x8x16xf32>
    %235 = vector.shape_cast %231 : vector<8x16xf32> to vector<1x8x16xf32>
    %236 = vector.shape_cast %232 : vector<8x16xf32> to vector<1x8x16xf32>
    %237 = vector.shape_cast %233 : vector<8x16xf32> to vector<1x8x16xf32>
    %238 = tpu.concatenate %234, %235, %236, %237 in 0 : vector<1x8x16xf32>, vector<1x8x16xf32>, vector<1x8x16xf32>, vector<1x8x16xf32> -> vector<4x8x16xf32>
    "tpu.trace_start"() <{level = 10 : i32, message = "nqd,nkd->nqk"}> : () -> ()
    %cst_83 = arith.constant dense<0.000000e+00> : vector<4x8x8xf32>
    %239 = tpu.matmul %220, %229, %cst_83 {dimension_numbers = #tpu.dot_dimension_numbers<[2], [2], [1], [1], [0, 0, 0, 1, 1, 1], [0], [0]>} : vector<4x8x16xf32>, vector<4x8x16xf32>, vector<4x8x8xf32> -> vector<4x8x8xf32>
    "tpu.trace_stop"() : () -> ()
    %cst_84 = arith.constant 2.500000e-01 : f32
    %240 = vector.broadcast %cst_84 : f32 to vector<4x8x8xf32>
    %241 = arith.mulf %239, %240 : vector<4x8x8xf32>
    %242 = arith.addf %241, %56 : vector<4x8x8xf32>
    %cst_85 = arith.constant dense<0xFF800000> : vector<4x8xf32>
    %243 = vector.multi_reduction <maximumf>, %242, %cst_85 [2] : vector<4x8x8xf32> to vector<4x8xf32>
    %244 = vector.shape_cast %243 : vector<4x8xf32> to vector<4x8x1xf32>
    %245 = vector.broadcast %244 : vector<4x8x1xf32> to vector<4x8x8xf32>
    %246 = arith.subf %242, %245 : vector<4x8x8xf32>
    %247 = math.exp %246 : vector<4x8x8xf32>
    %cst_86 = arith.constant dense<0.000000e+00> : vector<4x8xf32>
    %248 = vector.multi_reduction <add>, %247, %cst_86 [2] : vector<4x8x8xf32> to vector<4x8xf32>
    %249 = vector.shape_cast %248 : vector<4x8xf32> to vector<4x8x1xf32>
    %250 = tpu.reciprocal %249 {approx = true} : vector<4x8x1xf32> -> vector<4x8x1xf32>
    %251 = vector.broadcast %250 : vector<4x8x1xf32> to vector<4x8x8xf32>
    %252 = arith.mulf %247, %251 : vector<4x8x8xf32>
    "tpu.trace_start"() <{level = 10 : i32, message = "nqk,nkd->nqd"}> : () -> ()
    %cst_87 = arith.constant dense<0.000000e+00> : vector<4x8x16xf32>
    %253 = tpu.matmul %252, %238, %cst_87 {dimension_numbers = #tpu.dot_dimension_numbers<[2], [1], [1], [2], [0, 0, 0, 1, 1, 2], [0], [0]>} : vector<4x8x8xf32>, vector<4x8x16xf32>, vector<4x8x16xf32> -> vector<4x8x16xf32>
    "tpu.trace_stop"() : () -> ()
    %254 = vector.extract_strided_slice %253 {offsets = [0, 0, 0], sizes = [1, 8, 16], strides = [1, 1, 1]} : vector<4x8x16xf32> to vector<1x8x16xf32>
    %255 = vector.shape_cast %254 : vector<1x8x16xf32> to vector<8x16xf32>
    %256 = vector.extract_strided_slice %253 {offsets = [1, 0, 0], sizes = [1, 8, 16], strides = [1, 1, 1]} : vector<4x8x16xf32> to vector<1x8x16xf32>
    %257 = vector.shape_cast %256 : vector<1x8x16xf32> to vector<8x16xf32>
    %258 = tpu.concatenate %255, %257 in 1 : vector<8x16xf32>, vector<8x16xf32> -> vector<8x32xf32>
    %259 = vector.extract_strided_slice %253 {offsets = [2, 0, 0], sizes = [1, 8, 16], strides = [1, 1, 1]} : vector<4x8x16xf32> to vector<1x8x16xf32>
    %260 = vector.shape_cast %259 : vector<1x8x16xf32> to vector<8x16xf32>
    %261 = vector.extract_strided_slice %253 {offsets = [3, 0, 0], sizes = [1, 8, 16], strides = [1, 1, 1]} : vector<4x8x16xf32> to vector<1x8x16xf32>
    %262 = vector.shape_cast %261 : vector<1x8x16xf32> to vector<8x16xf32>
    %263 = tpu.concatenate %260, %262 in 1 : vector<8x16xf32>, vector<8x16xf32> -> vector<8x32xf32>
    %264 = tpu.concatenate %258, %263 in 0 : vector<8x32xf32>, vector<8x32xf32> -> vector<16x32xf32>
    %c1_88 = arith.constant 1 : index
    %c0_89 = arith.constant 0 : index
    %c0_90 = arith.constant 0 : index
    %265 = vector.load %arg9[%c1_88, %c0_89, %c0_90] : memref<2x32x32xf32, #tpu.memory_space<vmem>>, vector<1x32x32xf32>
    %266 = vector.shape_cast %265 : vector<1x32x32xf32> to vector<32x32xf32>
    %cst_91 = arith.constant dense<0.000000e+00> : vector<16x32xf32>
    %267 = tpu.matmul %264, %266, %cst_91 {dimension_numbers = #tpu.dot_dimension_numbers<[1], [0], [0], [1], [0, 0, 1, 1], [], []>} : vector<16x32xf32>, vector<32x32xf32>, vector<16x32xf32> -> vector<16x32xf32>
    %c1_92 = arith.constant 1 : index
    %c0_93 = arith.constant 0 : index
    %c0_94 = arith.constant 0 : index
    %268 = vector.load %arg10[%c1_92, %c0_93, %c0_94] : memref<2x1x32xf32, #tpu.memory_space<vmem>>, vector<1x1x32xf32>
    %269 = vector.shape_cast %268 : vector<1x1x32xf32> to vector<1x32xf32>
    %270 = vector.broadcast %269 : vector<1x32xf32> to vector<16x32xf32>
    %271 = arith.addf %267, %270 : vector<16x32xf32>
    %272 = arith.addf %204, %271 : vector<16x32xf32>
    %c1_95 = arith.constant 1 : index
    %c0_96 = arith.constant 0 : index
    %c0_97 = arith.constant 0 : index
    %273 = vector.load %arg11[%c1_95, %c0_96, %c0_97] : memref<2x1x32xf32, #tpu.memory_space<vmem>>, vector<1x1x32xf32>
    %274 = vector.shape_cast %273 : vector<1x1x32xf32> to vector<1x32xf32>
    %c1_98 = arith.constant 1 : index
    %c0_99 = arith.constant 0 : index
    %c0_100 = arith.constant 0 : index
    %275 = vector.load %arg12[%c1_98, %c0_99, %c0_100] : memref<2x1x32xf32, #tpu.memory_space<vmem>>, vector<1x1x32xf32>
    %276 = vector.shape_cast %275 : vector<1x1x32xf32> to vector<1x32xf32>
    %cst_101 = arith.constant dense<0.000000e+00> : vector<16xf32>
    %277 = vector.multi_reduction <add>, %272, %cst_101 [1] : vector<16x32xf32> to vector<16xf32>
    %278 = vector.shape_cast %277 : vector<16xf32> to vector<16x1xf32>
    %cst_102 = arith.constant 3.200000e+01 : f32
    %279 = vector.broadcast %cst_102 : f32 to vector<16x1xf32>
    %280 = arith.divf %278, %279 : vector<16x1xf32>
    %281 = vector.broadcast %280 : vector<16x1xf32> to vector<16x32xf32>
    %282 = arith.subf %272, %281 : vector<16x32xf32>
    %283 = arith.mulf %282, %282 : vector<16x32xf32>
    %cst_103 = arith.constant dense<0.000000e+00> : vector<16xf32>
    %284 = vector.multi_reduction <add>, %283, %cst_103 [1] : vector<16x32xf32> to vector<16xf32>
    %285 = vector.shape_cast %284 : vector<16xf32> to vector<16x1xf32>
    %cst_104 = arith.constant 3.200000e+01 : f32
    %286 = vector.broadcast %cst_104 : f32 to vector<16x1xf32>
    %287 = arith.divf %285, %286 : vector<16x1xf32>
    %288 = vector.broadcast %280 : vector<16x1xf32> to vector<16x32xf32>
    %289 = arith.subf %272, %288 : vector<16x32xf32>
    %cst_105 = arith.constant 9.99999996E-13 : f32
    %290 = vector.broadcast %cst_105 : f32 to vector<16x1xf32>
    %291 = arith.addf %287, %290 : vector<16x1xf32>
    %292 = math.rsqrt %291 : vector<16x1xf32>
    %293 = vector.broadcast %292 : vector<16x1xf32> to vector<16x32xf32>
    %294 = arith.mulf %289, %293 : vector<16x32xf32>
    %295 = vector.broadcast %274 : vector<1x32xf32> to vector<16x32xf32>
    %296 = arith.mulf %294, %295 : vector<16x32xf32>
    %297 = vector.broadcast %276 : vector<1x32xf32> to vector<16x32xf32>
    %298 = arith.addf %296, %297 : vector<16x32xf32>
    %c1_106 = arith.constant 1 : index
    %c0_107 = arith.constant 0 : index
    %c0_108 = arith.constant 0 : index
    %299 = vector.load %arg13[%c1_106, %c0_107, %c0_108] : memref<2x32x64xf32, #tpu.memory_space<vmem>>, vector<1x32x64xf32>
    %300 = vector.shape_cast %299 : vector<1x32x64xf32> to vector<32x64xf32>
    %cst_109 = arith.constant dense<0.000000e+00> : vector<16x64xf32>
    %301 = tpu.matmul %298, %300, %cst_109 {dimension_numbers = #tpu.dot_dimension_numbers<[1], [0], [0], [1], [0, 0, 1, 1], [], []>} : vector<16x32xf32>, vector<32x64xf32>, vector<16x64xf32> -> vector<16x64xf32>
    %c1_110 = arith.constant 1 : index
    %c0_111 = arith.constant 0 : index
    %c0_112 = arith.constant 0 : index
    %302 = vector.load %arg14[%c1_110, %c0_111, %c0_112] : memref<2x1x64xf32, #tpu.memory_space<vmem>>, vector<1x1x64xf32>
    %303 = vector.shape_cast %302 : vector<1x1x64xf32> to vector<1x64xf32>
    %304 = vector.broadcast %303 : vector<1x64xf32> to vector<16x64xf32>
    %305 = arith.addf %301, %304 : vector<16x64xf32>
    %cst_113 = arith.constant 5.000000e-01 : f32
    %306 = vector.broadcast %cst_113 : f32 to vector<16x64xf32>
    %307 = arith.mulf %306, %305 : vector<16x64xf32>
    %cst_114 = arith.constant 4.471500e-02 : f32
    %308 = vector.broadcast %cst_114 : f32 to vector<16x64xf32>
    %309 = arith.mulf %308, %305 : vector<16x64xf32>
    %310 = arith.mulf %309, %305 : vector<16x64xf32>
    %311 = arith.mulf %310, %305 : vector<16x64xf32>
    %312 = arith.addf %305, %311 : vector<16x64xf32>
    %cst_115 = arith.constant 0.797884583 : f32
    %313 = vector.broadcast %cst_115 : f32 to vector<16x64xf32>
    %314 = arith.mulf %313, %312 : vector<16x64xf32>
    %315 = math.tanh %314 : vector<16x64xf32>
    %cst_116 = arith.constant 1.000000e+00 : f32
    %316 = vector.broadcast %cst_116 : f32 to vector<16x64xf32>
    %317 = arith.addf %316, %315 : vector<16x64xf32>
    %318 = arith.mulf %307, %317 : vector<16x64xf32>
    %c1_117 = arith.constant 1 : index
    %c0_118 = arith.constant 0 : index
    %c0_119 = arith.constant 0 : index
    %319 = vector.load %arg15[%c1_117, %c0_118, %c0_119] : memref<2x64x32xf32, #tpu.memory_space<vmem>>, vector<1x64x32xf32>
    %320 = vector.shape_cast %319 : vector<1x64x32xf32> to vector<64x32xf32>
    %cst_120 = arith.constant dense<0.000000e+00> : vector<16x32xf32>
    %321 = tpu.matmul %318, %320, %cst_120 {dimension_numbers = #tpu.dot_dimension_numbers<[1], [0], [0], [1], [0, 0, 1, 1], [], []>} : vector<16x64xf32>, vector<64x32xf32>, vector<16x32xf32> -> vector<16x32xf32>
    %c1_121 = arith.constant 1 : index
    %c0_122 = arith.constant 0 : index
    %c0_123 = arith.constant 0 : index
    %322 = vector.load %arg16[%c1_121, %c0_122, %c0_123] : memref<2x1x32xf32, #tpu.memory_space<vmem>>, vector<1x1x32xf32>
    %323 = vector.shape_cast %322 : vector<1x1x32xf32> to vector<1x32xf32>
    %324 = vector.broadcast %323 : vector<1x32xf32> to vector<16x32xf32>
    %325 = arith.addf %321, %324 : vector<16x32xf32>
    %326 = arith.addf %298, %325 : vector<16x32xf32>
    %c1_124 = arith.constant 1 : index
    %c0_125 = arith.constant 0 : index
    %c0_126 = arith.constant 0 : index
    %327 = vector.load %arg17[%c1_124, %c0_125, %c0_126] : memref<2x1x32xf32, #tpu.memory_space<vmem>>, vector<1x1x32xf32>
    %328 = vector.shape_cast %327 : vector<1x1x32xf32> to vector<1x32xf32>
    %c1_127 = arith.constant 1 : index
    %c0_128 = arith.constant 0 : index
    %c0_129 = arith.constant 0 : index
    %329 = vector.load %arg18[%c1_127, %c0_128, %c0_129] : memref<2x1x32xf32, #tpu.memory_space<vmem>>, vector<1x1x32xf32>
    %330 = vector.shape_cast %329 : vector<1x1x32xf32> to vector<1x32xf32>
    %cst_130 = arith.constant dense<0.000000e+00> : vector<16xf32>
    %331 = vector.multi_reduction <add>, %326, %cst_130 [1] : vector<16x32xf32> to vector<16xf32>
    %332 = vector.shape_cast %331 : vector<16xf32> to vector<16x1xf32>
    %cst_131 = arith.constant 3.200000e+01 : f32
    %333 = vector.broadcast %cst_131 : f32 to vector<16x1xf32>
    %334 = arith.divf %332, %333 : vector<16x1xf32>
    %335 = vector.broadcast %334 : vector<16x1xf32> to vector<16x32xf32>
    %336 = arith.subf %326, %335 : vector<16x32xf32>
    %337 = arith.mulf %336, %336 : vector<16x32xf32>
    %cst_132 = arith.constant dense<0.000000e+00> : vector<16xf32>
    %338 = vector.multi_reduction <add>, %337, %cst_132 [1] : vector<16x32xf32> to vector<16xf32>
    %339 = vector.shape_cast %338 : vector<16xf32> to vector<16x1xf32>
    %cst_133 = arith.constant 3.200000e+01 : f32
    %340 = vector.broadcast %cst_133 : f32 to vector<16x1xf32>
    %341 = arith.divf %339, %340 : vector<16x1xf32>
    %342 = vector.broadcast %334 : vector<16x1xf32> to vector<16x32xf32>
    %343 = arith.subf %326, %342 : vector<16x32xf32>
    %cst_134 = arith.constant 9.99999996E-13 : f32
    %344 = vector.broadcast %cst_134 : f32 to vector<16x1xf32>
    %345 = arith.addf %341, %344 : vector<16x1xf32>
    %346 = math.rsqrt %345 : vector<16x1xf32>
    %347 = vector.broadcast %346 : vector<16x1xf32> to vector<16x32xf32>
    %348 = arith.mulf %343, %347 : vector<16x32xf32>
    %349 = vector.broadcast %328 : vector<1x32xf32> to vector<16x32xf32>
    %350 = arith.mulf %348, %349 : vector<16x32xf32>
    %351 = vector.broadcast %330 : vector<1x32xf32> to vector<16x32xf32>
    %352 = arith.addf %350, %351 : vector<16x32xf32>
    %c0_135 = arith.constant 0 : index
    %c0_136 = arith.constant 0 : index
    %353 = vector.load %arg19[%c0_135, %c0_136] : memref<32x128xf32, #tpu.memory_space<vmem>>, vector<32x128xf32>
    %cst_137 = arith.constant dense<0.000000e+00> : vector<16x128xf32>
    %354 = tpu.matmul %352, %353, %cst_137 {dimension_numbers = #tpu.dot_dimension_numbers<[1], [0], [0], [1], [0, 0, 1, 1], [], []>} : vector<16x32xf32>, vector<32x128xf32>, vector<16x128xf32> -> vector<16x128xf32>
    %c0_138 = arith.constant 0 : index
    %c0_139 = arith.constant 0 : index
    %355 = vector.load %arg20[%c0_138, %c0_139] : memref<1x128xf32, #tpu.memory_space<vmem>>, vector<1x128xf32>
    %356 = vector.broadcast %355 : vector<1x128xf32> to vector<16x128xf32>
    %357 = arith.addf %354, %356 : vector<16x128xf32>
    %c0_140 = arith.constant 0 : index
    %c0_141 = arith.constant 0 : index
    %358 = vector.load %arg21[%c0_140, %c0_141] : memref<16x128xf32, #tpu.memory_space<vmem>>, vector<16x128xf32>
    tpu.vector_store %arg21[%c0_140, %c0_141], %357 {strides = array<i32>} : memref<16x128xf32, #tpu.memory_space<vmem>>, vector<16x128xf32>,
    return
  }
  func.func @transform_0(%arg0: i32) -> (i32, i32) {
    %c0_i32 = arith.constant 0 : i32
    %c0_i32_0 = arith.constant 0 : i32
    %c0_i32_1 = arith.constant 0 : i32
    return %c0_i32, %c0_i32_0 : i32, i32
  }
  func.func @transform_1(%arg0: i32) -> (i32, i32) {
    %c0_i32 = arith.constant 0 : i32
    %c0_i32_0 = arith.constant 0 : i32
    %c0_i32_1 = arith.constant 0 : i32
    return %c0_i32, %c0_i32_0 : i32, i32
  }
  func.func @transform_2(%arg0: i32) -> (i32, i32) {
    %c0_i32 = arith.constant 0 : i32
    %c0_i32_0 = arith.constant 0 : i32
    %c0_i32_1 = arith.constant 0 : i32
    return %c0_i32, %c0_i32_0 : i32, i32
  }
  func.func @transform_3(%arg0: i32) -> (i32, i32) {
    %c0_i32 = arith.constant 0 : i32
    %c0_i32_0 = arith.constant 0 : i32
    %c0_i32_1 = arith.constant 0 : i32
    return %c0_i32, %c0_i32_0 : i32, i32
  }
  func.func @transform_4(%arg0: i32) -> (i32, i32) {
    %c0_i32 = arith.constant 0 : i32
    %c0_i32_0 = arith.constant 0 : i32
    %c0_i32_1 = arith.constant 0 : i32
    return %c0_i32, %c0_i32_0 : i32, i32
  }
  func.func @transform_5(%arg0: i32) -> (i32, i32) {
    %c0_i32 = arith.constant 0 : i32
    %c0_i32_0 = arith.constant 0 : i32
    %c0_i32_1 = arith.constant 0 : i32
    return %c0_i32, %c0_i32_0 : i32, i32
  }
  func.func @transform_6(%arg0: i32) -> (i32, i32, i32) {
    %c0_i32 = arith.constant 0 : i32
    %c0_i32_0 = arith.constant 0 : i32
    %c0_i32_1 = arith.constant 0 : i32
    %c0_i32_2 = arith.constant 0 : i32
    return %c0_i32, %c0_i32_0, %c0_i32_1 : i32, i32, i32
  }
  func.func @transform_7(%arg0: i32) -> (i32, i32, i32) {
    %c0_i32 = arith.constant 0 : i32
    %c0_i32_0 = arith.constant 0 : i32
    %c0_i32_1 = arith.constant 0 : i32
    %c0_i32_2 = arith.constant 0 : i32
    return %c0_i32, %c0_i32_0, %c0_i32_1 : i32, i32, i32
  }
  func.func @transform_8(%arg0: i32) -> (i32, i32, i32) {
    %c0_i32 = arith.constant 0 : i32
    %c0_i32_0 = arith.constant 0 : i32
    %c0_i32_1 = arith.constant 0 : i32
    %c0_i32_2 = arith.constant 0 : i32
    return %c0_i32, %c0_i32_0, %c0_i32_1 : i32, i32, i32
  }
  func.func @transform_9(%arg0: i32) -> (i32, i32, i32) {
    %c0_i32 = arith.constant 0 : i32
    %c0_i32_0 = arith.constant 0 : i32
    %c0_i32_1 = arith.constant 0 : i32
    %c0_i32_2 = arith.constant 0 : i32
    return %c0_i32, %c0_i32_0, %c0_i32_1 : i32, i32, i32
  }
  func.func @transform_10(%arg0: i32) -> (i32, i32, i32) {
    %c0_i32 = arith.constant 0 : i32
    %c0_i32_0 = arith.constant 0 : i32
    %c0_i32_1 = arith.constant 0 : i32
    %c0_i32_2 = arith.constant 0 : i32
    return %c0_i32, %c0_i32_0, %c0_i32_1 : i32, i32, i32
  }
  func.func @transform_11(%arg0: i32) -> (i32, i32, i32) {
    %c0_i32 = arith.constant 0 : i32
    %c0_i32_0 = arith.constant 0 : i32
    %c0_i32_1 = arith.constant 0 : i32
    %c0_i32_2 = arith.constant 0 : i32
    return %c0_i32, %c0_i32_0, %c0_i32_1 : i32, i32, i32
  }
  func.func @transform_12(%arg0: i32) -> (i32, i32, i32) {
    %c0_i32 = arith.constant 0 : i32
    %c0_i32_0 = arith.constant 0 : i32
    %c0_i32_1 = arith.constant 0 : i32
    %c0_i32_2 = arith.constant 0 : i32
    return %c0_i32, %c0_i32_0, %c0_i32_1 : i32, i32, i32
  }
  func.func @transform_13(%arg0: i32) -> (i32, i32, i32) {
    %c0_i32 = arith.constant 0 : i32
    %c0_i32_0 = arith.constant 0 : i32
    %c0_i32_1 = arith.constant 0 : i32
    %c0_i32_2 = arith.constant 0 : i32
    return %c0_i32, %c0_i32_0, %c0_i32_1 : i32, i32, i32
  }
  func.func @transform_14(%arg0: i32) -> (i32, i32, i32) {
    %c0_i32 = arith.constant 0 : i32
    %c0_i32_0 = arith.constant 0 : i32
    %c0_i32_1 = arith.constant 0 : i32
    %c0_i32_2 = arith.constant 0 : i32
    return %c0_i32, %c0_i32_0, %c0_i32_1 : i32, i32, i32
  }
  func.func @transform_15(%arg0: i32) -> (i32, i32, i32) {
    %c0_i32 = arith.constant 0 : i32
    %c0_i32_0 = arith.constant 0 : i32
    %c0_i32_1 = arith.constant 0 : i32
    %c0_i32_2 = arith.constant 0 : i32
    return %c0_i32, %c0_i32_0, %c0_i32_1 : i32, i32, i32
  }
  func.func @transform_16(%arg0: i32) -> (i32, i32, i32) {
    %c0_i32 = arith.constant 0 : i32
    %c0_i32_0 = arith.constant 0 : i32
    %c0_i32_1 = arith.constant 0 : i32
    %c0_i32_2 = arith.constant 0 : i32
    return %c0_i32, %c0_i32_0, %c0_i32_1 : i32, i32, i32
  }
  func.func @transform_17(%arg0: i32) -> (i32, i32, i32) {
    %c0_i32 = arith.constant 0 : i32
    %c0_i32_0 = arith.constant 0 : i32
    %c0_i32_1 = arith.constant 0 : i32
    %c0_i32_2 = arith.constant 0 : i32
    return %c0_i32, %c0_i32_0, %c0_i32_1 : i32, i32, i32
  }
  func.func @transform_18(%arg0: i32) -> (i32, i32) {
    %c0_i32 = arith.constant 0 : i32
    %c0_i32_0 = arith.constant 0 : i32
    %c0_i32_1 = arith.constant 0 : i32
    return %c0_i32, %c0_i32_0 : i32, i32
  }
  func.func @transform_19(%arg0: i32) -> (i32, i32) {
    %c0_i32 = arith.constant 0 : i32
    %c0_i32_0 = arith.constant 0 : i32
    %c0_i32_1 = arith.constant 0 : i32
    return %c0_i32, %c0_i32_0 : i32, i32
  }
  func.func @transform_20(%arg0: i32) -> (i32, i32) {
    %c0_i32 = arith.constant 0 : i32
    %c0_i32_0 = arith.constant 0 : i32
    %c0_i32_1 = arith.constant 0 : i32
    return %c0_i32, %c0_i32_0 : i32, i32
  }
}

</mosaic_0001>

<bundles_post_ra>
// kernel: forward.1
= control target key start
LH: loop header
LB: loop body
LE: loop exit
PB: predicated region body
PF: predicated region fallthrough
CT: control target
= control target key end

     0   :  { %v3240_v0 = vmov 0   ;;  %v3241_v15 = vmov 0.0   ;;  %v67_v16 = vlaneseq  ;;  %vm90_vm0 = vcmask 523264   ;;  %s3244_s29 = smov 112   ;;  %s3246_s27 = smov 16   ;;  %s3814_s0 = inlined_call_operand.vmem [shape: s32[16,1], index: 0, kind: input, shape index: {}]   ;;  %s3815_s2 = inlined_call_operand.vmem [shape: f32[64,32], index: 2, kind: input, shape index: {}]   ;;  %s3816_s3 = inlined_call_operand.vmem [shape: f32[8,32], index: 3, kind: input, shape index: {}]   ;;  %s3817_s6 = inlined_call_operand.vmem [shape: f32[2,32,96], index: 6, kind: input, shape index: {}]   ;;  %s3818_s4 = inlined_call_operand.vmem [shape: f32[1,32], index: 4, kind: input, shape index: {}]   ;;  %s3819_s5 = inlined_call_operand.vmem [shape: f32[1,32], index: 5, kind: input, shape index: {}]   ;;  %s3820_s7 = inlined_call_operand.vmem [shape: f32[2,1,96], index: 7, kind: input, shape index: {}]   ;;  %s3821_s1 = inlined_call_operand.vmem [shape: f32[2,8], index: 1, kind: input, shape index: {}]   ;;  %s3822_s8 = inlined_call_operand.vmem [shape: f32[2,32,32], index: 8, kind: input, shape index: {}]   ;;  %s3823_s9 = inlined_call_operand.vmem [shape: f32[2,1,32], index: 9, kind: input, shape index: {}]   ;;  %s3824_s12 = inlined_call_operand.vmem [shape: f32[2,32,64], index: 12, kind: input, shape index: {}]   ;;  %s3825_s10 = inlined_call_operand.vmem [shape: f32[2,1,32], index: 10, kind: input, shape index: {}]   ;;  %s3826_s11 = inlined_call_operand.vmem [shape: f32[2,1,32], index: 11, kind: input, shape index: {}]   ;;  %s3827_s14 = inlined_call_operand.vmem [shape: f32[2,64,32], index: 14, kind: input, shape index: {}]   ;;  %s3828_s13 = inlined_call_operand.vmem [shape: f32[2,1,64], index: 13, kind: input, shape index: {}]   ;;  %s3829_s15 = inlined_call_operand.vmem [shape: f32[2,1,32], index: 15, kind: input, shape index: {}]   ;;  %s3830_s16 = inlined_call_operand.vmem [shape: f32[2,1,32], index: 16, kind: input, shape index: {}]   ;;  %s3831_s17 = inlined_call_operand.vmem [shape: f32[2,1,32], index: 17, kind: input, shape index: {}]   ;;  %s3832_s18 = inlined_call_operand.vmem [shape: f32[32,128], index: 18, kind: input, shape index: {}]   ;;  %s3833_s19 = inlined_call_operand.vmem [shape: f32[1,128], index: 19, kind: input, shape index: {}]   ;;  %s3834_s20 = inlined_call_operand.vmem [shape: f32[16,128], index: 20, kind: output, shape index: {}]  }
   0x1   :  { %3838 = sst [smem:[#allocation2_spill]] %s3814_s0  ;;  %3179 = vset.pattern.permute.xlu0 %v3240_v0  ;;  %vm174_vm3 = vcmask 261120   ;;  %v2662_v54 = vld [vmem:[%s3819_s5] ss:$0 sm:$0xff]  ;;  %vm3242_vm4 = vmmov 0   ;;  %s3243_s5 = smov 96  }
   0x2   :  { %3839 = sst [smem:[#allocation3_spill]] %s3815_s2  ;;  %s3843_s23 = sld [smem:[#allocation2_spill]]  ;;  %v68_v17 = vand.u32 127, %v67_v16  ;;  %v2663_v61 = vld [vmem:[%s3820_s7] ss:$0 sm:$0xff]  ;;  %vm329_vm5 = vcmask 130048  }
   0x3   :  { %3840 = sst [smem:[#allocation4_spill]] %s3816_s3  ;;  %s3844_s25 = sld [smem:[#allocation3_spill]]  ;;  %vm640_vm6 = vcmask 64512  }
   0x4   :  { %3841 = sst [smem:[#allocation5_spill]] %s3817_s6  ;;  %s3845_s28 = sld [smem:[#allocation4_spill]] }
   0x5   :  { %3842 = sst [smem:[#allocation6_spill]] %s3818_s4  ;;  %s3846_s30 = sld [smem:[#allocation5_spill]] }
   0x6   :  { %s3847_s26 = sld [smem:[#allocation6_spill]] }
   0x8   :  { %v65_v1 = vld [vmem:[%s3843_s23] sm:$0xff]  ;;  %v66_v6 = vld [vmem:[%s3843_s23 + $0x8] sm:$0xff] }
   0x9   :  { %v81_v2 = vld [vmem:[%s3844_s25] sm:$0xff]  ;;  %70 = vperm.xlu0 %3179, %v65_v1   ;;  %v82_v3 = vld [vmem:[%s3844_s25 + $0x8] sm:$0xff]  ;;  %v83_v4 = vld [vmem:[%s3844_s25 + $0x10] sm:$0xff] }
   0xa   :  { %v84_v5 = vld [vmem:[%s3844_s25 + $0x18] sm:$0xff]  ;;  %v3068_v7 = vpack.c.bf16 %v82_v3, %v81_v2  ;;  %v85_v9 = vld [vmem:[%s3844_s25 + $0x20] sm:$0xff]  ;;  %v86_v10 = vld [vmem:[%s3844_s25 + $0x28] sm:$0xff] }
   0xb   :  { %v3072_v8 = vpack.c.bf16 %v84_v5, %v83_v4  ;;  %v3076_v11 = vpack.c.bf16 %v86_v10, %v85_v9  ;;  %v87_v12 = vld [vmem:[%s3844_s25 + $0x30] sm:$0xff]  ;;  %v88_v13 = vld [vmem:[%s3844_s25 + $0x38] sm:$0xff]  ;;  %v89_v22 = vld [vmem:[%s3845_s28] sm:$0xff] }
   0xc   :  { %3069 = vmatprep.subr.bf16.mxu0 %v3068_v7  ;;  %v3080_v14 = vpack.c.bf16 %v88_v13, %v87_v12  ;;  %v229_v39 = vld [vmem:[%s3846_s30] sm:$0xff]  ;;  %v230_v40 = vld [vmem:[%s3846_s30 + $0x8] sm:$0xff]  ;;  %v231_v41 = vld [vmem:[%s3846_s30 + $0x10] sm:$0xff] }
   0xd   :  { %73 = vperm.xlu0 %3179, %v66_v6   ;;  %3071 = vmatpush3.bf16.msra.mxu0 %v3068_v7  ;;  %v3084_v42 = vpack.c.bf16 %v230_v40, %v229_v39  ;;  %v232_v43 = vld [vmem:[%s3846_s30 + $0x18] sm:$0xff]  ;;  %v2661_v52 = vld [vmem:[%s3847_s26] ss:$0 sm:$0xff] }
   0xe   :  { %3073 = vmatprep.subr.bf16.mxu0 %v3072_v8  ;;  %v3088_v44 = vpack.c.bf16 %v232_v43, %v231_v41  ;;  %v218_v10 = vld [vmem:[%s3821_s1] sm:$0x3]  ;;  %s3245_s1 = smov 64  }
   0xf   :  { %3085 = vmatprep.subr.bf16.mxu1 %v3084_v42  ;;  %v219_v12 = vsub.f32 1.0, %v218_v10 }
  0x10   :  { %3087 = vmatpush3.bf16.msra.mxu1 %v3084_v42 }
  0x11   :  { %3075 = vmatpush3.bf16.msra.mxu0 %v3072_v8  ;;  %3089 = vmatprep.subr.bf16.mxu1 %v3088_v44 }
  0x12   :  { %3077 = vmatprep.subr.bf16.mxu0 %v3076_v11 }
  0x14   :  { %3091 = vmatpush3.bf16.msra.mxu1 %v3088_v44 }
  0x15   :  { %3079 = vmatpush3.bf16.msra.mxu0 %v3076_v11  ;;  %2884 = vmatprep.subr.mxu1 %v3241_v15  ;;  %v222_v11 = vshrl.u32 %v67_v16, 7 }
  0x16   :  { %3081 = vmatprep.subr.bf16.mxu0 %v3080_v14 }
  0x17   :  { %v223_v13 = vsub.s32 0, %v222_v11 }
  0x19   :  { %3083 = vmatpush3.bf16.msra.mxu0 %v3080_v14  ;;  %v220_v14 = vmul.f32 -1e+09, %v219_v12  ;;  %v1000_v12 = vld [vmem:[%s3822_s8 + $0x8] sm:$0xff] }
  0x1a   :  { %2904 = vmatprep.subr.mxu0 %v3241_v15 }
  0x88   :  { %v71_v18 = vpop.permute.xlu0 %70 }
  0x89   :  { %vm75_vm1 = vcmp.eq.s32.totalorder %v68_v17, %v71_v18  ;;  %v227_v18 = vsub.s32 1, %v222_v11  ;;  %v999_v11 = vld [vmem:[%s3822_s8] sm:$0xff] }
  0x8a   :  { %v2657_v19 = vsel %vm75_vm1, 1.0, %v3241_v15 }
  0x8b   :  { %2870 = vmatprep.mubr.msk.f32.mxu0 %vm90_vm0, %v2657_v19 }
  0x8c   :  { %v74_v20 = vpop.permute.xlu0 %73 }
  0x8d   :  { %vm76_vm2 = vcmp.eq.s32.totalorder %v68_v17, %v74_v20 }
  0x8e   :  { %v2658_v21 = vsel %vm76_vm2, 1.0, %v3241_v15 }
  0x8f   :  { %2871 = vmatmul.mubr.msk.f32.vlgmr.msra.gmra.mrb[0].mxu0 %vm90_vm0, %v2658_v21 }
  0x90   :  { %2906 = vmatprep.mubr.msk.f32.mxu0 %vm3242_vm4, %v3241_v15 }
 0x162   :  { %v2872_v23 = vpop.f32.mrb[0].mxu0 }
 0x163   :  { %v163_v24 = vpop.f32.mrb[1].mxu0  ;;  %v169_v26 = vadd.f32 %v2872_v23, %v89_v22 }
 0x164   :  { %v164_v25 = vadd.f32 %v163_v24, %v89_v22  ;;  %v3477_v22 = vrot.slane %v220_v14, %v223_v13  ;;  %v3092_v13 = vpack.c.bf16 %v1000_v12, %v999_v11  ;;  %v1249_v12 = vld [vmem:[%s3827_s14 + $0x10] sm:$0xff] }
 0x165   :  { %v178_v28 = vsel %vm174_vm3, %v169_v26, 0.0 }
 0x166   :  { %v175_v27 = vsel %vm174_vm3, %v164_v25, 0.0 }
 0x167   :  { %176 = vadd.xlane.f32.xlu1 %v175_v27 }
 0x16b   :  { %179 = vadd.xlane.f32.xlu1 %v178_v28  ;;  %v3482_v28 = vrot.slane %v220_v14, %v227_v18  ;;  %v1001_v14 = vld [vmem:[%s3822_s8 + $0x10] sm:$0xff] }
 0x1f4   :  { %v177_v29 = vpop.xlane.xlu1 %176 }
 0x1f5   :  { %v182_v30 = vmul.f32 0.03125, %v177_v29 }
 0x1f7   :  { %v184_v31 = vsub.f32 %v164_v25, %v182_v30 }
 0x1f8   :  { %v180_v32 = vpop.xlane.xlu1 %179 }
 0x1f9   :  { %v183_v33 = vmul.f32 0.03125, %v180_v32  ;;  %v186_v34 = vmul.f32 %v184_v31, %v184_v31 }
 0x1fb   :  { %v185_v35 = vsub.f32 %v169_v26, %v183_v33  ;;  %v188_v36 = vsel %vm174_vm3, %v186_v34, 0.0 }
 0x1fc   :  { %189 = vadd.xlane.f32.xlu0 %v188_v36 }
 0x1fd   :  { %v187_v37 = vmul.f32 %v185_v35, %v185_v35 }
 0x1ff   :  { %v191_v38 = vsel %vm174_vm3, %v187_v37, 0.0 }
 0x200   :  { %192 = vadd.xlane.f32.xlu1 %v191_v38 }
 0x289   :  { %v190_v45 = vpop.xlane.xlu0 %189 }
 0x28a   :  { %v194_v46 = vmul.f32 0.03125, %v190_v45 }
 0x28c   :  { %v196_v47 = vadd.f32 1e-12, %v194_v46 }
 0x28d   :  { %v193_v48 = vpop.xlane.xlu1 %192 }
 0x28e   :  { %3180 = vrsqrt.f32 %v196_v47  ;;  %v195_v49 = vmul.f32 0.03125, %v193_v48 }
 0x290   :  { %v197_v50 = vadd.f32 1e-12, %v195_v49 }
 0x292   :  { %3182 = vrsqrt.f32 %v197_v50 }
 0x298   :  { %v3181_v51 = vpop.eup %3180 }
 0x299   :  { %v200_v53 = vmul.f32 %v3181_v51, %v184_v31 }
 0x29b   :  { %v208_v55 = vmul.f32 %v2661_v52, %v200_v53 }
 0x29c   :  { %v3183_v56 = vpop.eup %3182 }
 0x29d   :  { %v201_v57 = vmul.f32 %v3183_v56, %v185_v35  ;;  %v3414_v58 = vadd.f32 %v2662_v54, %v208_v55 }
 0x29f   :  { %v209_v59 = vmul.f32 %v2661_v52, %v201_v57  ;;  %2881 = vmatprep.mubr.msk.f32.mxu1 %vm174_vm3, %v3414_v58 }
 0x2a1   :  { %v3418_v60 = vadd.f32 %v2662_v54, %v209_v59 }
 0x2a3   :  { %2882 = vmatmul.mubr.msk.f32.vlgmr.msra.gmra.mrb[0].mxu1 %vm174_vm3, %v3418_v60 }
 0x2a4   :  { %2886 = vmatprep.mubr.msk.f32.mxu1 %vm3242_vm4, %v3241_v15 }
 0x376   :  { %v2883_v62 = vpop.f32.mrb[0].mxu1 }
 0x377   :  { %v3429_v63 = vadd.f32 %v2883_v62, %v2663_v61  ;;  %v312_v0 = vpop.f32.mrb[1].mxu1 }
 0x378   :  { %v3431_v1 = vadd.f32 %v2663_v61, %v312_v0 }
 0x379   :  { %480 = vrot.lane.b32.xlu0 %v3429_v63, %s3243_s5 }
 0x37a   :  { %322 = vrot.lane.b32.xlu1 %v3431_v1, %s3244_s29 }
 0x37e   :  { %325 = vrot.lane.b32.xlu1 %v3429_v63, %s3244_s29 }
 0x382   :  { %327 = vrot.lane.b32.xlu1 %v3431_v1, %s3243_s5 }
 0x3eb   :  { %v481_v6 = vpop.permute.xlu0 %480 }
 0x3ec   :  { %v3441_v2 = vpop.permute.xlu1 %322 }
 0x3ed   :  { %404 = vrot.lane.b32.xlu1 %v3441_v2, %s3243_s5 }
 0x3f0   :  { %v3445_v3 = vpop.permute.xlu1 %325 }
 0x3f1   :  { %556 = vrot.lane.b32.xlu1 %v3445_v3, %s3243_s5 }
 0x3f4   :  { %v328_v4 = vpop.permute.xlu1 %327 }
 0x3f5   :  { %2885 = vmatpush3.xpose.msk.msra.mxu1 %vm329_vm5, %v328_v4 }
 0x3f6   :  { %2889 = vmatprep.subr.mxu1 %v3241_v15 }
 0x3f8   :  { %2887 = vmatmul.mubr.msk.f32.vlgmr.msra.gmra.mrb[2].mxu1 %vm329_vm5, %v3431_v1 }
 0x3f9   :  { %2891 = vmatprep.mubr.msk.f32.mxu1 %vm3242_vm4, %v3241_v15 }
 0x45f   :  { %v405_v5 = vpop.permute.xlu1 %404 }
 0x460   :  { %2890 = vmatpush3.xpose.msk.msra.mxu1 %vm329_vm5, %v405_v5 }
 0x461   :  { %2894 = vmatprep.subr.mxu1 %v3241_v15 }
 0x463   :  { %2892 = vmatmul.mubr.msk.f32.vlgmr.msra.gmra.mrb[4].mxu1 %vm329_vm5, %v3441_v2  ;;  %v557_v7 = vpop.permute.xlu1 %556 }
 0x464   :  { %2895 = vmatpush3.xpose.msk.msra.mxu1 %vm329_vm5, %v481_v6  ;;  %2896 = vmatprep.mubr.msk.f32.mxu1 %vm3242_vm4, %v3241_v15 }
 0x465   :  { %2899 = vmatprep.subr.mxu1 %v3241_v15 }
 0x467   :  { %2897 = vmatmul.mubr.msk.f32.vlgmr.msra.gmra.mrb[6].mxu1 %vm329_vm5, %v3429_v63 }
 0x468   :  { %2900 = vmatpush3.xpose.msk.msra.mxu1 %vm329_vm5, %v557_v7  ;;  %2901 = vmatprep.mubr.msk.f32.mxu1 %vm3242_vm4, %v3241_v15 }
 0x469   :  { %2909 = vmatprep.subr.mxu1 %v3241_v15 }
 0x46b   :  { %2902 = vmatmul.mubr.msk.f32.vlgmr.msra.gmra.mrb[8].mxu1 %vm329_vm5, %v3445_v3 }
 0x46c   :  { %2911 = vmatprep.mubr.msk.f32.mxu1 %vm3242_vm4, %v3241_v15 }
 0x4cb   :  { %v400_v8 = vpop.f32.mrb[2].mxu1 }
 0x4cc   :  { %v2888_v9 = vpop.f32.mrb[3].mxu1  ;;  %v632_v19 = vmul.f32 0.25, %v400_v8 }
 0x4ce   :  { %v636_v16 = vadd.f32 %v632_v19, %v3477_v22 }
 0x4d0   :  { %v641_v32 = vsel %vm640_vm6, %v636_v16, -inf }
 0x536   :  { %v476_v17 = vpop.f32.mrb[4].mxu1 }
 0x537   :  { %v633_v20 = vmul.f32 0.25, %v476_v17  ;;  %v2893_v21 = vpop.f32.mrb[5].mxu1  ;;  %v1002_v17 = vld [vmem:[%s3822_s8 + $0x18] sm:$0xff] }
 0x538   :  { %v3096_v18 = vpack.c.bf16 %v1002_v17, %v1001_v14  ;;  %v1251_v17 = vld [vmem:[%s3827_s14 + $0x20] sm:$0xff] }
 0x539   :  { %v637_v23 = vadd.f32 %v633_v20, %v3477_v22 }
 0x53a   :  { %v552_v24 = vpop.f32.mrb[6].mxu1 }
 0x53b   :  { %v634_v25 = vmul.f32 0.25, %v552_v24  ;;  %v2898_v26 = vpop.f32.mrb[7].mxu1  ;;  %v644_v27 = vsel %vm640_vm6, %v637_v23, -inf }
 0x53c   :  { %645 = vmax.xlane.f32.xlu1 %v644_v27 }
 0x53d   :  { %v638_v33 = vadd.f32 %v634_v25, %v3482_v28 }
 0x53e   :  { %v628_v29 = vpop.f32.mrb[8].mxu1 }
 0x53f   :  { %v635_v30 = vmul.f32 0.25, %v628_v29  ;;  %v2903_v31 = vpop.f32.mrb[9].mxu1  ;;  %v647_v35 = vsel %vm640_vm6, %v638_v33, -inf }
 0x540   :  { %642 = vmax.xlane.f32.xlu1 %v641_v32  ;;  %v2678_v32 = vld [vmem:[%s3823_s9] ss:$0 sm:$0xff] }
 0x541   :  { %v639_v34 = vadd.f32 %v635_v30, %v3482_v28 }
 0x543   :  { %v650_v36 = vsel %vm640_vm6, %v639_v34, -inf }
 0x544   :  { %648 = vmax.xlane.f32.xlu1 %v647_v35  ;;  %651 = vmax.xlane.f32.xlu0 %v650_v36 }
 0x5c9   :  { %v646_v37 = vpop.xlane.xlu1 %645 }
 0x5ca   :  { %v654_v38 = vsub.f32 %v637_v23, %v646_v37 }
 0x5cc   :  { %v659_v39 = vmul.f32 1.442695, %v654_v38 }
 0x5cd   :  { %v643_v47 = vpop.xlane.xlu1 %642 }
 0x5ce   :  { %3184 = vpow2.f32 %v659_v39  ;;  %v653_v48 = vsub.f32 %v636_v16, %v643_v47 }
 0x5d0   :  { %v657_v49 = vmul.f32 1.442695, %v653_v48 }
 0x5d1   :  { %v652_v40 = vpop.xlane.xlu0 %651  ;;  %v649_v50 = vpop.xlane.xlu1 %648 }
 0x5d2   :  { %v656_v41 = vsub.f32 %v639_v34, %v652_v40  ;;  %v655_v51 = vsub.f32 %v638_v33, %v649_v50  ;;  %v1138_v50 = vld [vmem:[%s3824_s12 + $0x8] sm:$0xff] }
 0x5d4   :  { %v663_v42 = vmul.f32 1.442695, %v656_v41  ;;  %v661_v52 = vmul.f32 1.442695, %v655_v51 }
 0x5d6   :  { %3186 = vpow2.f32 %v663_v42 }
 0x5d7   :  { %3188 = vpow2.f32 %v657_v49 }
 0x5d8   :  { %v3185_v43 = vpop.eup %3184  ;;  %3190 = vpow2.f32 %v661_v52  ;;  %v1139_v52 = vld [vmem:[%s3824_s12 + $0x10] sm:$0xff] }
 0x5d9   :  { %v668_v44 = vsel %vm640_vm6, %v3185_v43, 0.0 }
 0x5da   :  { %669 = vadd.xlane.f32.xlu1 %v668_v44 }
 0x5e0   :  { %v3187_v45 = vpop.eup %3186 }
 0x5e1   :  { %v674_v46 = vsel %vm640_vm6, %v3187_v45, 0.0  ;;  %v3189_v53 = vpop.eup %3188 }
 0x5e2   :  { %675 = vadd.xlane.f32.xlu0 %v674_v46  ;;  %v665_v54 = vsel %vm640_vm6, %v3189_v53, 0.0  ;;  %v3191_v55 = vpop.eup %3190 }
 0x5e3   :  { %v671_v56 = vsel %vm640_vm6, %v3191_v55, 0.0 }
 0x5eb   :  { %761 = vrot.lane.b32.xlu1 %v3441_v2, %s3245_s1 }
 0x5f8   :  { %913 = vrot.lane.b32.xlu0 %v3445_v3, %s3245_s1 }
 0x60f   :  { %666 = vadd.xlane.f32.xlu1 %v665_v54 }
 0x617   :  { %672 = vadd.xlane.f32.xlu0 %v671_v56 }
 0x620   :  { %685 = vrot.lane.b32.xlu1 %v3431_v1, %s3245_s1 }
 0x62d   :  { %837 = vrot.lane.b32.xlu0 %v3429_v63, %s3245_s1 }
 0x667   :  { %v670_v57 = vpop.xlane.xlu1 %669 }
 0x668   :  { %3192 = vrcp.f32 %v670_v57 }
 0x66b   :  { %v762_v59 = vpop.permute.xlu1 %761 }
 0x66c   :  { %2910 = vmatpush3.msra.mxu1 %v762_v59 }
 0x66d   :  { %2919 = vmatprep.subr.mxu1 %v3241_v15 }
 0x66f   :  { %v676_v61 = vpop.xlane.xlu0 %675 }
 0x670   :  { %3194 = vrcp.f32 %v676_v61 }
 0x672   :  { %v3193_v62 = vpop.eup %3192 }
 0x673   :  { %v682_v0 = vmul.f32 %v3193_v62, %v3185_v43  ;;  %v914_v2 = vpop.permute.xlu0 %913 }
 0x675   :  { %2912 = vmatmul.mubr.msk.f32.vlgmr.msra.gmra.mrb[10].mxu1 %vm640_vm6, %v682_v0 }
 0x676   :  { %2920 = vmatpush3.msra.mxu1 %v914_v2  ;;  %2921 = vmatprep.mubr.msk.f32.mxu1 %vm3242_vm4, %v3241_v15  ;;  %v2681_v2 = vld [vmem:[%s3825_s10] ss:$0 sm:$0xff] }
 0x67a   :  { %v3195_v1 = vpop.eup %3194 }
 0x67b   :  { %v684_v3 = vmul.f32 %v3195_v1, %v3187_v45 }
 0x67d   :  { %2922 = vmatmul.mubr.msk.f32.vlgmr.msra.gmra.mrb[12].mxu1 %vm640_vm6, %v684_v3  ;;  %v2682_v3 = vld [vmem:[%s3826_s11] ss:$0 sm:$0xff] }
 0x69c   :  { %v667_v63 = vpop.xlane.xlu1 %666 }
 0x69d   :  { %3196 = vrcp.f32 %v667_v63 }
 0x6a0   :  { %v686_v4 = vpop.permute.xlu1 %685 }
 0x6a1   :  { %2905 = vmatpush3.msra.mxu0 %v686_v4 }
 0x6a2   :  { %2914 = vmatprep.subr.mxu0 %v3241_v15 }
 0x6a4   :  { %v673_v5 = vpop.xlane.xlu0 %672 }
 0x6a5   :  { %3198 = vrcp.f32 %v673_v5 }
 0x6a7   :  { %v3197_v6 = vpop.eup %3196 }
 0x6a8   :  { %v681_v7 = vmul.f32 %v3197_v6, %v3189_v53  ;;  %v838_v8 = vpop.permute.xlu0 %837  ;;  %v1140_v53 = vld [vmem:[%s3824_s12 + $0x18] sm:$0xff] }
 0x6a9   :  { %v3104_v54 = vpack.c.bf16 %v1140_v53, %v1139_v52 }
 0x6aa   :  { %2907 = vmatmul.mubr.msk.f32.vlgmr.msra.gmra.mrb[2].mxu0 %vm640_vm6, %v681_v7 }
 0x6ab   :  { %2915 = vmatpush3.msra.mxu0 %v838_v8  ;;  %2916 = vmatprep.mubr.msk.f32.mxu0 %vm3242_vm4, %v3241_v15 }
 0x6ac   :  { %3093 = vmatprep.subr.bf16.mxu0 %v3092_v13 }
 0x6af   :  { %v3199_v9 = vpop.eup %3198 }
 0x6b0   :  { %v683_v10 = vmul.f32 %v3199_v9, %v3191_v55  ;;  %v1247_v9 = vld [vmem:[%s3827_s14] sm:$0xff] }
 0x6b2   :  { %2917 = vmatmul.mubr.msk.f32.vlgmr.msra.gmra.mrb[4].mxu0 %vm640_vm6, %v683_v10  ;;  %v1248_v10 = vld [vmem:[%s3827_s14 + $0x8] sm:$0xff] }
 0x6b3   :  { %3095 = vmatpush3.bf16.msra.mxu0 %v3092_v13  ;;  %v3108_v11 = vpack.c.bf16 %v1248_v10, %v1247_v9  ;;  %v1250_v13 = vld [vmem:[%s3827_s14 + $0x18] sm:$0xff] }
 0x6b4   :  { %3097 = vmatprep.subr.bf16.mxu0 %v3096_v18  ;;  %v3112_v14 = vpack.c.bf16 %v1250_v13, %v1249_v12 }
 0x6b7   :  { %3099 = vmatpush3.bf16.msra.mxu0 %v3096_v18  ;;  %v1252_v18 = vld [vmem:[%s3827_s14 + $0x28] sm:$0xff] }
 0x6b8   :  { %3109 = vmatprep.subr.bf16.mxu0 %v3108_v11 }
 0x748   :  { %v833_v19 = vpop.f32.mrb[10].mxu1 }
 0x749   :  { %990 = vrot.lane.b32.xlu1 %v833_v19, %s3246_s27  ;;  %v2913_v20 = vpop.f32.mrb[11].mxu1  ;;  %v3116_v19 = vpack.c.bf16 %v1252_v18, %v1251_v17  ;;  %v2689_v17 = vld [vmem:[%s3830_s16] ss:$0 sm:$0xff] }
 0x74a   :  { %v1253_v20 = vld [vmem:[%s3827_s14 + $0x30] sm:$0xff] }
 0x750   :  { %v985_v21 = vpop.f32.mrb[12].mxu1 }
 0x751   :  { %995 = vrot.lane.b32.xlu1 %v985_v21, %s3246_s27  ;;  %v2923_v23 = vpop.f32.mrb[13].mxu1  ;;  %v1254_v21 = vld [vmem:[%s3827_s14 + $0x38] sm:$0xff] }
 0x752   :  { %v3120_v23 = vpack.c.bf16 %v1254_v21, %v1253_v20  ;;  %v2690_v21 = vld [vmem:[%s3831_s17] ss:$0 sm:$0xff] }
 0x77d   :  { %v757_v24 = vpop.f32.mrb[2].mxu0 }
 0x77e   :  { %v2908_v25 = vpop.f32.mrb[3].mxu0 }
 0x785   :  { %v909_v26 = vpop.f32.mrb[4].mxu0 }
 0x786   :  { %v2918_v27 = vpop.f32.mrb[5].mxu0 }
 0x7bb   :  { %v991_v16 = vpop.permute.xlu1 %990 }
 0x7bc   :  { %v993_v29 = vsel %vm329_vm5, %v757_v24, %v991_v16  ;;  %v2683_v24 = vld [vmem:[%s3828_s13] ss:$0 sm:$0xff] }
 0x7bd   :  { %2932 = vmatprep.mubr.msk.f32.mxu0 %vm174_vm3, %v993_v29 }
 0x7c3   :  { %v996_v30 = vpop.permute.xlu1 %995 }
 0x7c4   :  { %v998_v31 = vsel %vm329_vm5, %v909_v26, %v996_v30 }
 0x7c5   :  { %2933 = vmatmul.mubr.msk.f32.vlgmr.msra.gmra.mrb[6].mxu0 %vm174_vm3, %v998_v31 }
 0x7c6   :  { %3111 = vmatpush3.bf16.msra.mxu0 %v3108_v11 }
 0x7c7   :  { %3113 = vmatprep.subr.bf16.mxu0 %v3112_v14 }
 0x7ca   :  { %3115 = vmatpush3.bf16.msra.mxu0 %v3112_v14 }
 0x7cb   :  { %3117 = vmatprep.subr.bf16.mxu0 %v3116_v19 }
 0x7ce   :  { %3119 = vmatpush3.bf16.msra.mxu0 %v3116_v19 }
 0x7cf   :  { %3121 = vmatprep.subr.bf16.mxu0 %v3120_v23 }
 0x7d2   :  { %3123 = vmatpush3.bf16.msra.mxu0 %v3120_v23 }
 0x7d3   :  { %2986 = vmatprep.subr.mxu0 %v3241_v15 }
 0x898   :  { %v2934_v33 = vpop.f32.mrb[6].mxu0 }
 0x899   :  { %v1088_v34 = vadd.f32 %v2934_v33, %v2678_v32  ;;  %v1082_v35 = vpop.f32.mrb[7].mxu0 }
 0x89a   :  { %v1083_v36 = vadd.f32 %v2678_v32, %v1082_v35 }
 0x89b   :  { %v1092_v37 = vadd.f32 %v1088_v34, %v3418_v60 }
 0x89c   :  { %v1091_v38 = vadd.f32 %v1083_v36, %v3414_v58  ;;  %v1137_v58 = vld [vmem:[%s3824_s12] sm:$0xff] }
 0x89d   :  { %v1098_v39 = vsel %vm174_vm3, %v1092_v37, 0.0  ;;  %v3100_v51 = vpack.c.bf16 %v1138_v50, %v1137_v58 }
 0x89e   :  { %1099 = vadd.xlane.f32.xlu1 %v1098_v39  ;;  %v1095_v40 = vsel %vm174_vm3, %v1091_v38, 0.0 }
 0x89f   :  { %1096 = vadd.xlane.f32.xlu0 %v1095_v40  ;;  %3101 = vmatprep.subr.bf16.mxu1 %v3100_v51 }
 0x8a0   :  { %3103 = vmatpush3.bf16.msra.mxu1 %v3100_v51 }
 0x8a1   :  { %3105 = vmatprep.subr.bf16.mxu1 %v3104_v54 }
 0x8a4   :  { %3107 = vmatpush3.bf16.msra.mxu1 %v3104_v54 }
 0x92b   :  { %v1100_v41 = vpop.xlane.xlu1 %1099 }
 0x92c   :  { %v1102_v42 = vmul.f32 0.03125, %v1100_v41  ;;  %v1097_v43 = vpop.xlane.xlu0 %1096 }
 0x92d   :  { %v1101_v44 = vmul.f32 0.03125, %v1097_v43 }
 0x92e   :  { %v1104_v45 = vsub.f32 %v1092_v37, %v1102_v42 }
 0x92f   :  { %v1103_v46 = vsub.f32 %v1091_v38, %v1101_v44 }
 0x930   :  { %v1106_v49 = vmul.f32 %v1104_v45, %v1104_v45 }
 0x931   :  { %v1105_v47 = vmul.f32 %v1103_v46, %v1103_v46 }
 0x932   :  { %v1110_v60 = vsel %vm174_vm3, %v1106_v49, 0.0 }
 0x933   :  { %v1107_v48 = vsel %vm174_vm3, %v1105_v47, 0.0  ;;  %v2686_v47 = vld [vmem:[%s3829_s15] ss:$0 sm:$0xff] }
 0x934   :  { %1108 = vadd.xlane.f32.xlu0 %v1107_v48 }
 0x938   :  { %1111 = vadd.xlane.f32.xlu0 %v1110_v60 }
 0x9c1   :  { %v1109_v55 = vpop.xlane.xlu0 %1108 }
 0x9c2   :  { %v1113_v56 = vmul.f32 0.03125, %v1109_v55 }
 0x9c4   :  { %v1115_v57 = vadd.f32 1e-12, %v1113_v56 }
 0x9c5   :  { %v1112_v59 = vpop.xlane.xlu0 %1111 }
 0x9c6   :  { %3200 = vrsqrt.f32 %v1115_v57  ;;  %v1114_v61 = vmul.f32 0.03125, %v1112_v59 }
 0x9c8   :  { %v1116_v62 = vadd.f32 1e-12, %v1114_v61 }
 0x9ca   :  { %3202 = vrsqrt.f32 %v1116_v62 }
 0x9d0   :  { %v3201_v0 = vpop.eup %3200 }
 0x9d1   :  { %v1119_v1 = vmul.f32 %v3201_v0, %v1103_v46 }
 0x9d3   :  { %v1127_v63 = vmul.f32 %v2681_v2, %v1119_v1 }
 0x9d4   :  { %v3203_v4 = vpop.eup %3202 }
 0x9d5   :  { %v1120_v5 = vmul.f32 %v3203_v4, %v1104_v45  ;;  %v3556_v6 = vadd.f32 %v2682_v3, %v1127_v63  ;;  %v2692_v63 = vld [vmem:[%s3846_s30 + $0x28] sm:$0xff] }
 0x9d7   :  { %v1128_v7 = vmul.f32 %v2681_v2, %v1120_v5  ;;  %2943 = vmatprep.mubr.msk.f32.mxu1 %vm174_vm3, %v3556_v6  ;;  %v2693_v5 = vld [vmem:[%s3846_s30 + $0x30] sm:$0xff] }
 0x9d9   :  { %v1136_v8 = vadd.f32 %v2682_v3, %v1128_v7  ;;  %v2691_v3 = vld [vmem:[%s3846_s30 + $0x20] sm:$0xff] }
 0x9da   :  { %v3124_v4 = vpack.c.bf16 %v2692_v63, %v2691_v3 }
 0x9db   :  { %2944 = vmatmul.mubr.msk.f32.vlgmr.msra.gmra.mrb[14].mxu1 %vm174_vm3, %v1136_v8 }
 0x9dc   :  { %3125 = vmatprep.subr.bf16.mxu1 %v3124_v4 }
 0x9dd   :  { %3127 = vmatpush3.bf16.msra.mxu1 %v3124_v4 }
 0xaae   :  { %v2945_v25 = vpop.f32.mrb[14].mxu1 }
 0xaaf   :  { %v1226_v26 = vadd.f32 %v2945_v25, %v2683_v24  ;;  %v1220_v27 = vpop.f32.mrb[15].mxu1 }
 0xab0   :  { %v1221_v16 = vadd.f32 %v2683_v24, %v1220_v27  ;;  %v2696_v27 = vld [vmem:[%s3820_s7 + $0x1] ss:$0 sm:$0xff] }
 0xab1   :  { %v1232_v29 = vmul.f32 0.044715, %v1226_v26  ;;  %v1230_v44 = vmul.f32 0.5, %v1226_v26 }
 0xab2   :  { %v1231_v30 = vmul.f32 0.044715, %v1221_v16  ;;  %v1229_v42 = vmul.f32 0.5, %v1221_v16 }
 0xab3   :  { %v1234_v31 = vmul.f32 %v1232_v29, %v1226_v26 }
 0xab4   :  { %v1233_v32 = vmul.f32 %v1231_v30, %v1221_v16 }
 0xab5   :  { %v1236_v33 = vmul.f32 %v1234_v31, %v1226_v26 }
 0xab6   :  { %v1235_v34 = vmul.f32 %v1233_v32, %v1221_v16 }
 0xab7   :  { %v1238_v35 = vadd.f32 %v1236_v33, %v1226_v26 }
 0xab8   :  { %v1237_v36 = vadd.f32 %v1235_v34, %v1221_v16 }
 0xab9   :  { %v1240_v37 = vmul.f32 0.7978846, %v1238_v35 }
 0xaba   :  { %v1239_v38 = vmul.f32 0.7978846, %v1237_v36 }
 0xabb   :  { %3204 = vtanh.f32 %v1240_v37 }
 0xabc   :  { %3206 = vtanh.f32 %v1239_v38 }
 0xac5   :  { %v3205_v39 = vpop.eup %3204 }
 0xac6   :  { %v3207_v40 = vpop.eup %3206  ;;  %v1244_v41 = vadd.f32 1.0, %v3205_v39 }
 0xac7   :  { %v1243_v43 = vadd.f32 1.0, %v3207_v40 }
 0xac8   :  { %v1246_v46 = vmul.f32 %v1244_v41, %v1230_v44 }
 0xac9   :  { %v1245_v45 = vmul.f32 %v1243_v43, %v1229_v42 }
 0xacb   :  { %2962 = vmatprep.mubr.msk.f32.mxu0 %vm90_vm0, %v1245_v45 }
 0xacc   :  { %2963 = vmatmul.mubr.msk.f32.vlgmr.msra.gmra.mrb[8].mxu0 %vm90_vm0, %v1246_v46 }
 0xacd   :  { %2988 = vmatprep.mubr.msk.f32.mxu0 %vm3242_vm4, %v3241_v15 }
 0xb9f   :  { %v2964_v48 = vpop.f32.mrb[8].mxu0 }
 0xba0   :  { %v1340_v49 = vadd.f32 %v2964_v48, %v2686_v47  ;;  %v1334_v60 = vpop.f32.mrb[9].mxu0 }
 0xba1   :  { %v1335_v58 = vadd.f32 %v2686_v47, %v1334_v60 }
 0xba2   :  { %v1344_v50 = vadd.f32 %v1340_v49, %v1136_v8 }
 0xba3   :  { %v1343_v51 = vadd.f32 %v1335_v58, %v3556_v6  ;;  %v2694_v6 = vld [vmem:[%s3846_s30 + $0x38] sm:$0xff] }
 0xba4   :  { %v1350_v52 = vsel %vm174_vm3, %v1344_v50, 0.0  ;;  %v3128_v7 = vpack.c.bf16 %v2694_v6, %v2693_v5 }
 0xba5   :  { %1351 = vadd.xlane.f32.xlu0 %v1350_v52  ;;  %v1347_v53 = vsel %vm174_vm3, %v1343_v51, 0.0 }
 0xba6   :  { %1348 = vadd.xlane.f32.xlu1 %v1347_v53  ;;  %3129 = vmatprep.subr.bf16.mxu1 %v3128_v7 }
 0xba7   :  { %3131 = vmatpush3.bf16.msra.mxu1 %v3128_v7 }
 0xba8   :  { %2976 = vmatprep.subr.mxu1 %v3241_v15 }
 0xc32   :  { %v1352_v54 = vpop.xlane.xlu0 %1351 }
 0xc33   :  { %v1354_v55 = vmul.f32 0.03125, %v1352_v54  ;;  %v1349_v56 = vpop.xlane.xlu1 %1348 }
 0xc34   :  { %v1353_v57 = vmul.f32 0.03125, %v1349_v56 }
 0xc35   :  { %v1356_v59 = vsub.f32 %v1344_v50, %v1354_v55 }
 0xc36   :  { %v1355_v61 = vsub.f32 %v1343_v51, %v1353_v57 }
 0xc37   :  { %v1358_v62 = vmul.f32 %v1356_v59, %v1356_v59 }
 0xc38   :  { %v1357_v0 = vmul.f32 %v1355_v61, %v1355_v61 }
 0xc39   :  { %v1362_v2 = vsel %vm174_vm3, %v1358_v62, 0.0 }
 0xc3a   :  { %1363 = vadd.xlane.f32.xlu0 %v1362_v2  ;;  %v1359_v1 = vsel %vm174_vm3, %v1357_v0, 0.0 }
 0xc3b   :  { %1360 = vadd.xlane.f32.xlu1 %v1359_v1 }
 0xcc7   :  { %v1364_v8 = vpop.xlane.xlu0 %1363 }
 0xcc8   :  { %v1366_v9 = vmul.f32 0.03125, %v1364_v8  ;;  %v1361_v10 = vpop.xlane.xlu1 %1360 }
 0xcc9   :  { %v1365_v11 = vmul.f32 0.03125, %v1361_v10 }
 0xcca   :  { %v1368_v12 = vadd.f32 1e-12, %v1366_v9 }
 0xccb   :  { %v1367_v13 = vadd.f32 1e-12, %v1365_v11 }
 0xccc   :  { %3208 = vrsqrt.f32 %v1368_v12 }
 0xccd   :  { %3210 = vrsqrt.f32 %v1367_v13 }
 0xcd6   :  { %v3209_v14 = vpop.eup %3208 }
 0xcd7   :  { %v3211_v18 = vpop.eup %3210  ;;  %v1372_v19 = vmul.f32 %v3209_v14, %v1356_v59 }
 0xcd8   :  { %v1371_v20 = vmul.f32 %v3211_v18, %v1355_v61 }
 0xcd9   :  { %v1380_v23 = vmul.f32 %v2689_v17, %v1372_v19 }
 0xcda   :  { %v1379_v24 = vmul.f32 %v2689_v17, %v1371_v20 }
 0xcdb   :  { %v3622_v26 = vadd.f32 %v2690_v21, %v1380_v23 }
 0xcdc   :  { %v3620_v25 = vadd.f32 %v2690_v21, %v1379_v24 }
 0xcde   :  { %2973 = vmatprep.mubr.msk.f32.mxu1 %vm174_vm3, %v3620_v25 }
 0xcdf   :  { %2974 = vmatmul.mubr.msk.f32.vlgmr.msra.gmra.mrb[16].mxu1 %vm174_vm3, %v3622_v26 }
 0xce0   :  { %2978 = vmatprep.mubr.msk.f32.mxu1 %vm3242_vm4, %v3241_v15 }
 0xdb2   :  { %v2975_v16 = vpop.f32.mrb[16].mxu1 }
 0xdb3   :  { %v3633_v29 = vadd.f32 %v2975_v16, %v2696_v27  ;;  %v1474_v30 = vpop.f32.mrb[17].mxu1 }
 0xdb4   :  { %v3635_v31 = vadd.f32 %v2696_v27, %v1474_v30 }
 0xdb5   :  { %1487 = vrot.lane.b32.xlu0 %v3633_v29, %s3244_s29 }
 0xdb6   :  { %1484 = vrot.lane.b32.xlu1 %v3635_v31, %s3244_s29 }
 0xdba   :  { %1489 = vrot.lane.b32.xlu1 %v3635_v31, %s3243_s5 }
 0xe27   :  { %v3643_v32 = vpop.permute.xlu0 %1487 }
 0xe28   :  { %1717 = vrot.lane.b32.xlu0 %v3643_v32, %s3243_s5  ;;  %v1485_v33 = vpop.permute.xlu1 %1484 }
 0xe29   :  { %1565 = vrot.lane.b32.xlu1 %v1485_v33, %s3243_s5 }
 0xe2c   :  { %v1490_v34 = vpop.permute.xlu1 %1489 }
 0xe2d   :  { %1641 = vrot.lane.b32.xlu1 %v3633_v29, %s3243_s5  ;;  %2977 = vmatpush3.xpose.msk.msra.mxu1 %vm329_vm5, %v1490_v34  ;;  %v2712_v34 = vld [vmem:[%s3822_s8 + $0x28] sm:$0xff] }
 0xe2e   :  { %2981 = vmatprep.subr.mxu1 %v3241_v15 }
 0xe30   :  { %2979 = vmatmul.mubr.msk.f32.vlgmr.msra.gmra.mrb[18].mxu1 %vm329_vm5, %v3635_v31 }
 0xe31   :  { %2983 = vmatprep.mubr.msk.f32.mxu1 %vm3242_vm4, %v3241_v15 }
 0xe9a   :  { %v1718_v36 = vpop.permute.xlu0 %1717 }
 0xe9b   :  { %v1566_v35 = vpop.permute.xlu1 %1565 }
 0xe9c   :  { %2982 = vmatpush3.xpose.msk.msra.mxu1 %vm329_vm5, %v1566_v35 }
 0xe9d   :  { %2991 = vmatprep.subr.mxu1 %v3241_v15 }
 0xe9f   :  { %2984 = vmatmul.mubr.msk.f32.vlgmr.msra.gmra.mrb[20].mxu1 %vm329_vm5, %v1485_v33  ;;  %v1642_v37 = vpop.permute.xlu1 %1641 }
 0xea0   :  { %2987 = vmatpush3.xpose.msk.msra.mxu0 %vm329_vm5, %v1642_v37  ;;  %2992 = vmatpush3.xpose.msk.msra.mxu1 %vm329_vm5, %v1718_v36  ;;  %v2713_v36 = vld [vmem:[%s3822_s8 + $0x30] sm:$0xff] }
 0xea1   :  { %2993 = vmatprep.mubr.msk.f32.mxu1 %vm3242_vm4, %v3241_v15  ;;  %3001 = vmatprep.subr.mxu1 %v3241_v15 }
 0xea2   :  { %2996 = vmatprep.subr.mxu0 %v3241_v15 }
 0xea3   :  { %2989 = vmatmul.mubr.msk.f32.vlgmr.msra.gmra.mrb[10].mxu0 %vm329_vm5, %v3633_v29  ;;  %2994 = vmatmul.mubr.msk.f32.vlgmr.msra.gmra.mrb[22].mxu1 %vm329_vm5, %v3643_v32 }
 0xea4   :  { %3003 = vmatprep.mubr.msk.f32.mxu1 %vm3242_vm4, %v3241_v15  ;;  %2998 = vmatprep.mubr.msk.f32.mxu0 %vm3242_vm4, %v3241_v15 }
 0xf03   :  { %v1561_v38 = vpop.f32.mrb[18].mxu1 }
 0xf04   :  { %v2980_v39 = vpop.f32.mrb[19].mxu1  ;;  %v1793_v41 = vmul.f32 0.25, %v1561_v38 }
 0xf06   :  { %v1797_v50 = vadd.f32 %v1793_v41, %v3477_v22 }
 0xf08   :  { %v1801_v52 = vsel %vm640_vm6, %v1797_v50, -inf }
 0xf72   :  { %v1637_v40 = vpop.f32.mrb[20].mxu1 }
 0xf73   :  { %v1794_v42 = vmul.f32 0.25, %v1637_v40  ;;  %v2985_v43 = vpop.f32.mrb[21].mxu1 }
 0xf75   :  { %v1798_v44 = vadd.f32 %v1794_v42, %v3477_v22 }
 0xf76   :  { %v1713_v45 = vpop.f32.mrb[10].mxu0  ;;  %v1789_v46 = vpop.f32.mrb[22].mxu1 }
 0xf77   :  { %v1795_v47 = vmul.f32 0.25, %v1713_v45  ;;  %v1796_v48 = vmul.f32 0.25, %v1789_v46  ;;  %v2990_v49 = vpop.f32.mrb[11].mxu0  ;;  %v2995_v60 = vpop.f32.mrb[23].mxu1  ;;  %v1804_v58 = vsel %vm640_vm6, %v1798_v44, -inf }
 0xf78   :  { %1805 = vmax.xlane.f32.xlu0 %v1804_v58  ;;  %v2716_v60 = vld [vmem:[%s3823_s9 + $0x1] ss:$0 sm:$0xff] }
 0xf79   :  { %v1800_v51 = vadd.f32 %v1796_v48, %v3482_v28  ;;  %v1799_v54 = vadd.f32 %v1795_v47, %v3482_v28 }
 0xf7b   :  { %v1810_v53 = vsel %vm640_vm6, %v1800_v51, -inf  ;;  %v1807_v55 = vsel %vm640_vm6, %v1799_v54, -inf }
 0xf7c   :  { %1802 = vmax.xlane.f32.xlu0 %v1801_v52  ;;  %1811 = vmax.xlane.f32.xlu1 %v1810_v53 }
 0xf80   :  { %1808 = vmax.xlane.f32.xlu0 %v1807_v55 }
0x1005   :  { %v1806_v56 = vpop.xlane.xlu0 %1805 }
0x1006   :  { %v1814_v57 = vsub.f32 %v1798_v44, %v1806_v56 }
0x1008   :  { %v1819_v59 = vmul.f32 1.442695, %v1814_v57 }
0x1009   :  { %v1812_v61 = vpop.xlane.xlu1 %1811  ;;  %v1803_v3 = vpop.xlane.xlu0 %1802 }
0x100a   :  { %3212 = vpow2.f32 %v1819_v59  ;;  %v1816_v22 = vsub.f32 %v1800_v51, %v1812_v61  ;;  %v1813_v63 = vsub.f32 %v1797_v50, %v1803_v3  ;;  %v2724_v3 = vld [vmem:[%s3824_s12 + $0x28] sm:$0xff] }
0x100c   :  { %v1823_v62 = vmul.f32 1.442695, %v1816_v22  ;;  %v1817_v5 = vmul.f32 1.442695, %v1813_v63 }
0x100d   :  { %v1809_v4 = vpop.xlane.xlu0 %1808 }
0x100e   :  { %3214 = vpow2.f32 %v1823_v62  ;;  %v1815_v6 = vsub.f32 %v1799_v54, %v1809_v4  ;;  %v2725_v4 = vld [vmem:[%s3824_s12 + $0x30] sm:$0xff] }
0x100f   :  { %3216 = vpow2.f32 %v1817_v5  ;;  %v2726_v5 = vld [vmem:[%s3824_s12 + $0x38] sm:$0xff] }
0x1010   :  { %v1821_v7 = vmul.f32 1.442695, %v1815_v6  ;;  %v3144_v6 = vpack.c.bf16 %v2726_v5, %v2725_v4 }
0x1012   :  { %3218 = vpow2.f32 %v1821_v7 }
0x1014   :  { %v3213_v0 = vpop.eup %3212 }
0x1015   :  { %v1828_v2 = vsel %vm640_vm6, %v3213_v0, 0.0 }
0x1016   :  { %1829 = vadd.xlane.f32.xlu1 %v1828_v2 }
0x1018   :  { %v3215_v1 = vpop.eup %3214 }
0x1019   :  { %v1834_v28 = vsel %vm640_vm6, %v3215_v1, 0.0  ;;  %v3217_v8 = vpop.eup %3216 }
0x101a   :  { %1835 = vadd.xlane.f32.xlu0 %v1834_v28  ;;  %v1825_v9 = vsel %vm640_vm6, %v3217_v8, 0.0 }
0x101c   :  { %v3219_v10 = vpop.eup %3218 }
0x101d   :  { %v1831_v11 = vsel %vm640_vm6, %v3219_v10, 0.0 }
0x1027   :  { %1921 = vrot.lane.b32.xlu1 %v1485_v33, %s3245_s1  ;;  %v2711_v33 = vld [vmem:[%s3822_s8 + $0x20] sm:$0xff] }
0x1028   :  { %v3132_v35 = vpack.c.bf16 %v2712_v34, %v2711_v33  ;;  %v2735_v33 = vld [vmem:[%s3827_s14 + $0x60] sm:$0xff] }
0x1030   :  { %2073 = vrot.lane.b32.xlu0 %v3643_v32, %s3245_s1 }
0x104b   :  { %1826 = vadd.xlane.f32.xlu1 %v1825_v9 }
0x104f   :  { %1832 = vadd.xlane.f32.xlu0 %v1831_v11 }
0x105c   :  { %1845 = vrot.lane.b32.xlu1 %v3635_v31, %s3245_s1 }
0x1065   :  { %1997 = vrot.lane.b32.xlu0 %v3633_v29, %s3245_s1 }
0x10a3   :  { %v1830_v12 = vpop.xlane.xlu1 %1829 }
0x10a4   :  { %3220 = vrcp.f32 %v1830_v12 }
0x10a7   :  { %v1922_v13 = vpop.permute.xlu1 %1921  ;;  %v1836_v14 = vpop.xlane.xlu0 %1835 }
0x10a8   :  { %3002 = vmatpush3.msra.mxu1 %v1922_v13  ;;  %3222 = vrcp.f32 %v1836_v14  ;;  %v2721_v14 = vld [vmem:[%s3825_s10 + $0x1] ss:$0 sm:$0xff] }
0x10a9   :  { %3011 = vmatprep.subr.mxu1 %v3241_v15 }
0x10ab   :  { %v2074_v19 = vpop.permute.xlu0 %2073 }
0x10ae   :  { %v3221_v17 = vpop.eup %3220 }
0x10af   :  { %v1842_v18 = vmul.f32 %v3221_v17, %v3213_v0 }
0x10b1   :  { %3004 = vmatmul.mubr.msk.f32.vlgmr.msra.gmra.mrb[24].mxu1 %vm640_vm6, %v1842_v18  ;;  %v2722_v18 = vld [vmem:[%s3826_s11 + $0x1] ss:$0 sm:$0xff] }
0x10b2   :  { %3012 = vmatpush3.msra.mxu1 %v2074_v19  ;;  %3013 = vmatprep.mubr.msk.f32.mxu1 %vm3242_vm4, %v3241_v15  ;;  %v3223_v20 = vpop.eup %3222 }
0x10b3   :  { %v1844_v21 = vmul.f32 %v3223_v20, %v3215_v1 }
0x10b5   :  { %3014 = vmatmul.mubr.msk.f32.vlgmr.msra.gmra.mrb[26].mxu1 %vm640_vm6, %v1844_v21 }
0x10d8   :  { %v1827_v23 = vpop.xlane.xlu1 %1826 }
0x10d9   :  { %3224 = vrcp.f32 %v1827_v23 }
0x10dc   :  { %v1846_v24 = vpop.permute.xlu1 %1845  ;;  %v1833_v27 = vpop.xlane.xlu0 %1832 }
0x10dd   :  { %2997 = vmatpush3.msra.mxu0 %v1846_v24  ;;  %3226 = vrcp.f32 %v1833_v27 }
0x10de   :  { %3006 = vmatprep.subr.mxu0 %v3241_v15 }
0x10e0   :  { %v1998_v30 = vpop.permute.xlu0 %1997 }
0x10e3   :  { %v3225_v16 = vpop.eup %3224 }
0x10e4   :  { %v1841_v29 = vmul.f32 %v3225_v16, %v3217_v8  ;;  %v2731_v16 = vld [vmem:[%s3827_s14 + $0x40] sm:$0xff] }
0x10e6   :  { %2999 = vmatmul.mubr.msk.f32.vlgmr.msra.gmra.mrb[12].mxu0 %vm640_vm6, %v1841_v29  ;;  %v2732_v29 = vld [vmem:[%s3827_s14 + $0x48] sm:$0xff] }
0x10e7   :  { %3007 = vmatpush3.msra.mxu0 %v1998_v30  ;;  %3008 = vmatprep.mubr.msk.f32.mxu0 %vm3242_vm4, %v3241_v15  ;;  %v3227_v31 = vpop.eup %3226  ;;  %v2714_v15 = vld [vmem:[%s3822_s8 + $0x38] sm:$0xff]  ;;  %v3148_v30 = vpack.c.bf16 %v2732_v29, %v2731_v16 }
0x10e8   :  { %v1843_v32 = vmul.f32 %v3227_v31, %v3219_v10  ;;  %3133 = vmatprep.subr.bf16.mxu0 %v3132_v35  ;;  %v3136_v37 = vpack.c.bf16 %v2714_v15, %v2713_v36  ;;  %v2733_v31 = vld [vmem:[%s3827_s14 + $0x50] sm:$0xff] }
0x10e9   :  { %v2737_v15 = vld [vmem:[%s3827_s14 + $0x70] sm:$0xff] }
0x10ea   :  { %3009 = vmatmul.mubr.msk.f32.vlgmr.msra.gmra.mrb[14].mxu0 %vm640_vm6, %v1843_v32  ;;  %v2734_v32 = vld [vmem:[%s3827_s14 + $0x58] sm:$0xff] }
0x10eb   :  { %3135 = vmatpush3.bf16.msra.mxu0 %v3132_v35  ;;  %v3152_v34 = vpack.c.bf16 %v2734_v32, %v2733_v31  ;;  %v2736_v35 = vld [vmem:[%s3827_s14 + $0x68] sm:$0xff]  ;;  %v2745_v31 = vld [vmem:[%s3830_s16 + $0x1] ss:$0 sm:$0xff] }
0x10ec   :  { %3137 = vmatprep.subr.bf16.mxu0 %v3136_v37  ;;  %v3156_v36 = vpack.c.bf16 %v2736_v35, %v2735_v33  ;;  %v2746_v35 = vld [vmem:[%s3831_s17 + $0x1] ss:$0 sm:$0xff] }
0x10ef   :  { %3139 = vmatpush3.bf16.msra.mxu0 %v3136_v37  ;;  %v2738_v37 = vld [vmem:[%s3827_s14 + $0x78] sm:$0xff] }
0x10f0   :  { %3149 = vmatprep.subr.bf16.mxu0 %v3148_v30 }
0x1184   :  { %v1993_v38 = vpop.f32.mrb[24].mxu1 }
0x1185   :  { %2150 = vrot.lane.b32.xlu1 %v1993_v38, %s3246_s27  ;;  %v3005_v39 = vpop.f32.mrb[25].mxu1  ;;  %v3160_v38 = vpack.c.bf16 %v2738_v37, %v2737_v15 }
0x1186   :  { %v2728_v39 = vld [vmem:[%s3828_s13 + $0x1] ss:$0 sm:$0xff] }
0x1188   :  { %v2145_v40 = vpop.f32.mrb[26].mxu1 }
0x1189   :  { %2155 = vrot.lane.b32.xlu1 %v2145_v40, %s3246_s27  ;;  %v3015_v41 = vpop.f32.mrb[27].mxu1 }
0x11b9   :  { %v1917_v42 = vpop.f32.mrb[12].mxu0 }
0x11ba   :  { %v3000_v43 = vpop.f32.mrb[13].mxu0 }
0x11bd   :  { %v2069_v44 = vpop.f32.mrb[14].mxu0 }
0x11be   :  { %v3010_v45 = vpop.f32.mrb[15].mxu0 }
0x11f7   :  { %v2151_v46 = vpop.permute.xlu1 %2150 }
0x11f8   :  { %v2153_v47 = vsel %vm329_vm5, %v1917_v42, %v2151_v46 }
0x11f9   :  { %3024 = vmatprep.mubr.msk.f32.mxu0 %vm174_vm3, %v2153_v47 }
0x11fb   :  { %v2156_v48 = vpop.permute.xlu1 %2155 }
0x11fc   :  { %v2158_v49 = vsel %vm329_vm5, %v2069_v44, %v2156_v48 }
0x11fd   :  { %3025 = vmatmul.mubr.msk.f32.vlgmr.msra.gmra.mrb[16].mxu0 %vm174_vm3, %v2158_v49 }
0x11fe   :  { %3151 = vmatpush3.bf16.msra.mxu0 %v3148_v30 }
0x11ff   :  { %3153 = vmatprep.subr.bf16.mxu0 %v3152_v34 }
0x1202   :  { %3155 = vmatpush3.bf16.msra.mxu0 %v3152_v34 }
0x1203   :  { %3157 = vmatprep.subr.bf16.mxu0 %v3156_v36 }
0x1206   :  { %3159 = vmatpush3.bf16.msra.mxu0 %v3156_v36 }
0x1207   :  { %3161 = vmatprep.subr.bf16.mxu0 %v3160_v38 }
0x120a   :  { %3163 = vmatpush3.bf16.msra.mxu0 %v3160_v38 }
0x12d0   :  { %v3026_v58 = vpop.f32.mrb[16].mxu0 }
0x12d1   :  { %v2250_v50 = vadd.f32 %v3026_v58, %v2716_v60  ;;  %v2244_v51 = vpop.f32.mrb[17].mxu0 }
0x12d2   :  { %v2245_v52 = vadd.f32 %v2716_v60, %v2244_v51 }
0x12d3   :  { %v2254_v53 = vadd.f32 %v2250_v50, %v3622_v26 }
0x12d4   :  { %v2253_v54 = vadd.f32 %v2245_v52, %v3620_v25  ;;  %v2723_v25 = vld [vmem:[%s3824_s12 + $0x20] sm:$0xff] }
0x12d5   :  { %v2262_v55 = vsel %vm174_vm3, %v2254_v53, 0.0  ;;  %v3140_v63 = vpack.c.bf16 %v2724_v3, %v2723_v25 }
0x12d6   :  { %2263 = vadd.xlane.f32.xlu1 %v2262_v55  ;;  %v2259_v56 = vsel %vm174_vm3, %v2253_v54, 0.0 }
0x12d7   :  { %2260 = vadd.xlane.f32.xlu0 %v2259_v56  ;;  %3141 = vmatprep.subr.bf16.mxu1 %v3140_v63 }
0x12d8   :  { %3143 = vmatpush3.bf16.msra.mxu1 %v3140_v63 }
0x12d9   :  { %3145 = vmatprep.subr.bf16.mxu1 %v3144_v6 }
0x12dc   :  { %3147 = vmatpush3.bf16.msra.mxu1 %v3144_v6 }
0x1363   :  { %v2264_v57 = vpop.xlane.xlu1 %2263 }
0x1364   :  { %v2266_v59 = vmul.f32 0.03125, %v2264_v57  ;;  %v2261_v61 = vpop.xlane.xlu0 %2260 }
0x1365   :  { %v2265_v22 = vmul.f32 0.03125, %v2261_v61 }
0x1366   :  { %v2268_v62 = vsub.f32 %v2254_v53, %v2266_v59 }
0x1367   :  { %v2267_v0 = vsub.f32 %v2253_v54, %v2265_v22  ;;  %v2740_v22 = vld [vmem:[%s3829_s15 + $0x1] ss:$0 sm:$0xff] }
0x1368   :  { %v2270_v28 = vmul.f32 %v2268_v62, %v2268_v62 }
0x1369   :  { %v2269_v2 = vmul.f32 %v2267_v0, %v2267_v0 }
0x136a   :  { %v2274_v26 = vsel %vm174_vm3, %v2270_v28, 0.0 }
0x136b   :  { %v2271_v1 = vsel %vm174_vm3, %v2269_v2, 0.0 }
0x136c   :  { %2272 = vadd.xlane.f32.xlu0 %v2271_v1 }
0x1370   :  { %2275 = vadd.xlane.f32.xlu0 %v2274_v26 }
0x13f9   :  { %v2273_v7 = vpop.xlane.xlu0 %2272 }
0x13fa   :  { %v2277_v8 = vmul.f32 0.03125, %v2273_v7 }
0x13fc   :  { %v2279_v9 = vadd.f32 1e-12, %v2277_v8 }
0x13fd   :  { %v2276_v10 = vpop.xlane.xlu0 %2275 }
0x13fe   :  { %3228 = vrsqrt.f32 %v2279_v9  ;;  %v2278_v11 = vmul.f32 0.03125, %v2276_v10 }
0x1400   :  { %v2280_v12 = vadd.f32 1e-12, %v2278_v11 }
0x1402   :  { %3230 = vrsqrt.f32 %v2280_v12 }
0x1408   :  { %v3229_v13 = vpop.eup %3228 }
0x1409   :  { %v2283_v17 = vmul.f32 %v3229_v13, %v2267_v0  ;;  %v2559_v13 = vld [vmem:[%s3832_s18] sm:$0xff] }
0x140b   :  { %v2291_v19 = vmul.f32 %v2721_v14, %v2283_v17 }
0x140c   :  { %v3231_v20 = vpop.eup %3230 }
0x140d   :  { %v2284_v21 = vmul.f32 %v3231_v20, %v2268_v62  ;;  %v2299_v23 = vadd.f32 %v2722_v18, %v2291_v19  ;;  %v2562_v19 = vld [vmem:[%s3832_s18 + $0x18] sm:$0xff] }
0x140f   :  { %v2292_v24 = vmul.f32 %v2721_v14, %v2284_v21  ;;  %3035 = vmatprep.mubr.msk.f32.mxu1 %vm174_vm3, %v2299_v23  ;;  %v2560_v14 = vld [vmem:[%s3832_s18 + $0x8] sm:$0xff] }
0x1410   :  { %v3164_v17 = vpack.c.bf16 %v2560_v14, %v2559_v13 }
0x1411   :  { %v2300_v27 = vadd.f32 %v2722_v18, %v2292_v24  ;;  %v2561_v18 = vld [vmem:[%s3832_s18 + $0x10] sm:$0xff] }
0x1412   :  { %3165 = vmatprep.subr.bf16.mxu1 %v3164_v17  ;;  %v3168_v20 = vpack.c.bf16 %v2562_v19, %v2561_v18 }
0x1413   :  { %3036 = vmatmul.mubr.msk.f32.vlgmr.msra.gmra.mrb[28].mxu1 %vm174_vm3, %v2300_v27 }
0x1414   :  { %3167 = vmatpush3.bf16.msra.mxu1 %v3164_v17 }
0x1415   :  { %3169 = vmatprep.subr.bf16.mxu1 %v3168_v20 }
0x1418   :  { %3171 = vmatpush3.bf16.msra.mxu1 %v3168_v20 }
0x14e6   :  { %v3037_v40 = vpop.f32.mrb[28].mxu1 }
0x14e7   :  { %v2392_v41 = vadd.f32 %v3037_v40, %v2728_v39  ;;  %v2386_v42 = vpop.f32.mrb[29].mxu1 }
0x14e8   :  { %v2387_v43 = vadd.f32 %v2728_v39, %v2386_v42  ;;  %v2747_v39 = vld [vmem:[%s3833_s19] ss:$0 sm:$0xff] }
0x14e9   :  { %v2398_v44 = vmul.f32 0.044715, %v2392_v41  ;;  %v2396_v57 = vmul.f32 0.5, %v2392_v41 }
0x14ea   :  { %v2397_v45 = vmul.f32 0.044715, %v2387_v43  ;;  %v2395_v55 = vmul.f32 0.5, %v2387_v43 }
0x14eb   :  { %v2400_v46 = vmul.f32 %v2398_v44, %v2392_v41 }
0x14ec   :  { %v2399_v47 = vmul.f32 %v2397_v45, %v2387_v43 }
0x14ed   :  { %v2402_v48 = vmul.f32 %v2400_v46, %v2392_v41 }
0x14ee   :  { %v2401_v49 = vmul.f32 %v2399_v47, %v2387_v43 }
0x14ef   :  { %v2404_v60 = vadd.f32 %v2402_v48, %v2392_v41 }
0x14f0   :  { %v2403_v58 = vadd.f32 %v2401_v49, %v2387_v43 }
0x14f1   :  { %v2406_v50 = vmul.f32 0.7978846, %v2404_v60 }
0x14f2   :  { %v2405_v51 = vmul.f32 0.7978846, %v2403_v58 }
0x14f3   :  { %3232 = vtanh.f32 %v2406_v50 }
0x14f4   :  { %3234 = vtanh.f32 %v2405_v51 }
0x14fd   :  { %v3233_v52 = vpop.eup %3232 }
0x14fe   :  { %v3235_v53 = vpop.eup %3234  ;;  %v2410_v54 = vadd.f32 1.0, %v3233_v52 }
0x14ff   :  { %v2409_v56 = vadd.f32 1.0, %v3235_v53 }
0x1500   :  { %v2412_v61 = vmul.f32 %v2410_v54, %v2396_v57 }
0x1501   :  { %v2411_v59 = vmul.f32 %v2409_v56, %v2395_v55 }
0x1503   :  { %3054 = vmatprep.mubr.msk.f32.mxu0 %vm90_vm0, %v2411_v59 }
0x1504   :  { %3055 = vmatmul.mubr.msk.f32.vlgmr.msra.gmra.mrb[18].mxu0 %vm90_vm0, %v2412_v61 }
0x15d7   :  { %v3056_v62 = vpop.f32.mrb[18].mxu0 }
0x15d8   :  { %v2508_v0 = vadd.f32 %v3056_v62, %v2740_v22  ;;  %v2502_v2 = vpop.f32.mrb[19].mxu0 }
0x15d9   :  { %v2503_v1 = vadd.f32 %v2740_v22, %v2502_v2 }
0x15da   :  { %v2512_v28 = vadd.f32 %v2508_v0, %v2300_v27 }
0x15db   :  { %v2511_v26 = vadd.f32 %v2503_v1, %v2299_v23 }
0x15dc   :  { %v2520_v25 = vsel %vm174_vm3, %v2512_v28, 0.0 }
0x15dd   :  { %2521 = vadd.xlane.f32.xlu0 %v2520_v25  ;;  %v2517_v3 = vsel %vm174_vm3, %v2511_v26, 0.0 }
0x15de   :  { %2518 = vadd.xlane.f32.xlu1 %v2517_v3 }
0x166a   :  { %v2522_v63 = vpop.xlane.xlu0 %2521 }
0x166b   :  { %v2524_v4 = vmul.f32 0.03125, %v2522_v63  ;;  %v2519_v5 = vpop.xlane.xlu1 %2518 }
0x166c   :  { %v2523_v6 = vmul.f32 0.03125, %v2519_v5 }
0x166d   :  { %v2526_v7 = vsub.f32 %v2512_v28, %v2524_v4 }
0x166e   :  { %v2525_v8 = vsub.f32 %v2511_v26, %v2523_v6 }
0x166f   :  { %v2528_v9 = vmul.f32 %v2526_v7, %v2526_v7 }
0x1670   :  { %v2527_v10 = vmul.f32 %v2525_v8, %v2525_v8 }
0x1671   :  { %v2532_v11 = vsel %vm174_vm3, %v2528_v9, 0.0 }
0x1672   :  { %2533 = vadd.xlane.f32.xlu0 %v2532_v11  ;;  %v2529_v12 = vsel %vm174_vm3, %v2527_v10, 0.0 }
0x1673   :  { %2530 = vadd.xlane.f32.xlu1 %v2529_v12 }
0x16ff   :  { %v2534_v21 = vpop.xlane.xlu0 %2533 }
0x1700   :  { %v2536_v23 = vmul.f32 0.03125, %v2534_v21  ;;  %v2531_v24 = vpop.xlane.xlu1 %2530 }
0x1701   :  { %v2535_v27 = vmul.f32 0.03125, %v2531_v24 }
0x1702   :  { %v2538_v16 = vadd.f32 1e-12, %v2536_v23 }
0x1703   :  { %v2537_v29 = vadd.f32 1e-12, %v2535_v27 }
0x1704   :  { %3236 = vrsqrt.f32 %v2538_v16 }
0x1705   :  { %3238 = vrsqrt.f32 %v2537_v29 }
0x170e   :  { %v3237_v30 = vpop.eup %3236 }
0x170f   :  { %v3239_v32 = vpop.eup %3238  ;;  %v2542_v33 = vmul.f32 %v3237_v30, %v2526_v7 }
0x1710   :  { %v2541_v34 = vmul.f32 %v3239_v32, %v2525_v8 }
0x1711   :  { %v2550_v36 = vmul.f32 %v2745_v31, %v2542_v33 }
0x1712   :  { %v2549_v15 = vmul.f32 %v2745_v31, %v2541_v34 }
0x1713   :  { %v2558_v38 = vadd.f32 %v2746_v35, %v2550_v36 }
0x1714   :  { %v2557_v37 = vadd.f32 %v2746_v35, %v2549_v15 }
0x1716   :  { %3065 = vmatprep.mubr.msk.f32.mxu1 %vm174_vm3, %v2557_v37 }
0x1717   :  { %3066 = vmatmul.mubr.msk.f32.vlgmr.msra.gmra.mrb[30].mxu1 %vm174_vm3, %v2558_v38 }
0x17ea   :  { %v3067_v40 = vpop.f32.mrb[30].mxu1 }
0x17eb   :  { %v2648_v41 = vadd.f32 %v3067_v40, %v2747_v39  ;;  %v2642_v42 = vpop.f32.mrb[31].mxu1 }
0x17ec   :  { %v2643_v43 = vadd.f32 %v2747_v39, %v2642_v42 }
0x17ed   :  { %2652 = vst [vmem:[%s3834_s20 + $0x8] sm:$0xff] %v2648_v41 }
0x17ee   :  { %2651 = vst [vmem:[%s3834_s20] sm:$0xff] %v2643_v43 }

</bundles_post_ra>
